<compile_context>
chip_gen: v5e
topology: v5e:2x2
jax: 0.10.0
libtpu: 0.0.40
codegen_flags: <defaults>
</compile_context>

<pallas_src>
import jax
import jax.numpy as jnp
from jax.experimental import pallas as pl
from jax.experimental.pallas import tpu as pltpu


# ----------------------------------------------------------------------------
# Kernel
# ----------------------------------------------------------------------------
def gru_kernel(x_ref, w_ih_ref, w_hh_ref, bias_ref, h_out_ref, xp_ref, h_ref):
    """GRU recurrence over one (batch block, time chunk).

    x_ref:     (TB, SC, F)   bf16 batch-major input slab
    w_ih_ref:  (F,  3Hp)     bf16 packed input weights,  gate cols [r | z | n]
    w_hh_ref:  (Hp, 3Hp)     bf16 packed hidden weights, gate cols [r | z | n]
    bias_ref:  (2,  3Hp)     f32  row 0 = input bias, row 1 = hidden bias
    h_out_ref: (TB, Hp)      f32  final hidden state (written at last chunk)
    xp_ref:    (TB, SC, 3Hp) f32  VMEM scratch: hoisted input projections
    h_ref:     (TB, Hp)      f32  VMEM scratch: hidden state carried across chunks
    """
    TB, SC, F = x_ref.shape
    Hp = w_hh_ref.shape[0]
    H3 = 3 * Hp
    s_chunk = pl.program_id(1)

    @pl.when(s_chunk == 0)
    def _init():
        h_ref[...] = jnp.zeros_like(h_ref)

    bias = bias_ref[...]
    # Hoisted bias broadcasts (JAX does not CSE broadcast_in_dim in loops).
    b_i = jnp.broadcast_to(bias[0:1, :], (TB * SC, H3))
    b_h = jnp.broadcast_to(bias[1:2, :], (TB, H3))

    # --- One fused input-projection matmul for the whole slab:
    # (TB*SC, F) @ (F, 3Hp) + b_i, written to a VMEM scratch.  This is the
    # only place x is read; it is off the serial critical path and uses
    # M = TB*SC rows of the MXU instead of TB rows per step.
    x_all = x_ref[...].reshape(TB * SC, F)
    xp_all = jnp.dot(x_all, w_ih_ref[...],
                     preferred_element_type=jnp.float32) + b_i
    xp_ref[...] = xp_all.reshape(TB, SC, H3)

    W_hh = w_hh_ref[...]
    h = h_ref[...]
    # --- Serial recurrence over this chunk (SC is a small static constant,
    # so static unroll keeps LLO scheduling visibility; for very long chunks
    # switch to lax.fori_loop with pl.ds reads from xp_ref).
    for t in range(SC):
        xp_t = xp_ref[:, t, :]                                    # (TB, 3Hp)
        hp = jnp.dot(h.astype(W_hh.dtype), W_hh,
                     preferred_element_type=jnp.float32) + b_h    # (TB, 3Hp)
        # All slices below are on 128-lane (Hp) boundaries -> full-vreg ops.
        rz = jax.nn.sigmoid(xp_t[:, :2 * Hp] + hp[:, :2 * Hp])    # (TB, 2Hp)
        r = rz[:, :Hp]
        z = rz[:, Hp:]
        n = jnp.tanh(xp_t[:, 2 * Hp:] + r * hp[:, 2 * Hp:])
        h = (1.0 - z) * n + z * h
    h_ref[...] = h

    @pl.when(s_chunk == pl.num_programs(1) - 1)
    def _finalize():
        h_out_ref[...] = h_ref[...].astype(h_out_ref.dtype)


# ----------------------------------------------------------------------------
# Wrapper
# ----------------------------------------------------------------------------
def _choose_time_chunk(S):
    if S <= 32:
        return S
    for c in (32, 24, 16, 8):
        if S % c == 0:
            return c
    return S


def embed_forward(x, packed, *, batch_block=None, time_chunk=None):
    """Mirrors Embed.forward: returns (last_hidden, representation).

    last_hidden:    (num_layers=1, B, H)
    representation: (B, H)  == last_hidden[-1]
    """
    B, S, F = x.shape
    H = packed["hidden_dim"]
    W_ih, W_hh, bias = packed["w_ih"], packed["w_hh"], packed["bias"]
    Hp = W_hh.shape[0]
    H3p = 3 * Hp

    # Batch tile: keep M per step as large as possible (recurrence is
    # latency-bound; batch is the only dim filling MXU rows).  Only split
    # across the grid (and across TensorCores on v7x) for genuinely large B.
    if batch_block is None:
        batch_block = B if B <= 256 else 256
    assert B % batch_block == 0
    assert batch_block == B or batch_block % 8 == 0

    if time_chunk is None:
        time_chunk = _choose_time_chunk(S)
    assert S % time_chunk == 0
    assert time_chunk == S or time_chunk % 8 == 0

    x_bf16 = x.astype(jnp.bfloat16)           # halve HBM/VMEM traffic for x

    n_b = B // batch_block
    n_s = S // time_chunk

    flops = 2 * B * S * F * H3p + 2 * B * S * Hp * H3p
    bytes_accessed = (x_bf16.size * 2 + W_ih.size * 2 + W_hh.size * 2
                      + bias.size * 4 + B * Hp * 4)

    # VMEM budget: double-buffered x slab + resident weights + scratches.
    vmem_need = (2 * batch_block * time_chunk * F * 2
                 + W_ih.size * 2 + W_hh.size * 2 + bias.size * 4
                 + batch_block * time_chunk * H3p * 4        # xp scratch
                 + 2 * batch_block * Hp * 4)                  # h scratch + out
    vmem_limit = int(min(max(2 * vmem_need, 16 * 1024 * 1024),
                         64 * 1024 * 1024))

    h_last_padded = pl.pallas_call(
        gru_kernel,
        out_shape=jax.ShapeDtypeStruct((B, Hp), jnp.float32),
        grid_spec=pltpu.PrefetchScalarGridSpec(
            num_scalar_prefetch=0,
            grid=(n_b, n_s),                  # (batch: parallel, time: arbitrary)
            in_specs=[
                pl.BlockSpec((batch_block, time_chunk, F), lambda b, s: (b, s, 0)),
                pl.BlockSpec((F, H3p), lambda b, s: (0, 0)),
                pl.BlockSpec((Hp, H3p), lambda b, s: (0, 0)),
                pl.BlockSpec((2, H3p), lambda b, s: (0, 0)),
            ],
            out_specs=pl.BlockSpec((batch_block, Hp), lambda b, s: (b, 0)),
            scratch_shapes=[
                pltpu.VMEM((batch_block, time_chunk, H3p), jnp.float32),
                pltpu.VMEM((batch_block, Hp), jnp.float32),
            ]),
        compiler_params=pltpu.CompilerParams(
            dimension_semantics=("parallel", "arbitrary"),
            vmem_limit_bytes=vmem_limit),
        cost_estimate=pl.CostEstimate(
            flops=int(flops),
            transcendentals=int(3 * B * S * Hp),
            bytes_accessed=int(bytes_accessed)),
    )(x_bf16, W_ih, W_hh, bias)

    h_last = h_last_padded[:, :H]             # drop lane padding
    last_hidden = h_last[None, :, :]          # (1, B, H)  -- nn.GRU last_hidden
    representation = h_last                   # (B, H)     -- last_hidden[-1]
    return last_hidden, representation


# ----------------------------------------------------------------------------
# Parameter init / packing
# ----------------------------------------------------------------------------
def init_gru_params(key, num_features, hidden_dim):
    """PyTorch nn.GRU-shaped parameters, gate order (r, z, n)."""
    k = 1.0 / jnp.sqrt(hidden_dim)
    keys = jax.random.split(key, 4)
    w_ih = jax.random.uniform(keys[0], (3 * hidden_dim, num_features),
                              jnp.float32, -k, k)
    w_hh = jax.random.uniform(keys[1], (3 * hidden_dim, hidden_dim),
                              jnp.float32, -k, k)
    b_ih = jax.random.uniform(keys[2], (3 * hidden_dim,), jnp.float32, -k, k)
    b_hh = jax.random.uniform(keys[3], (3 * hidden_dim,), jnp.float32, -k, k)
    return {"w_ih": w_ih, "w_hh": w_hh, "b_ih": b_ih, "b_hh": b_hh}


def _pad_gates_last(a, H, Hp):
    """(..., 3H) -> (..., 3Hp): each gate block [r|z|n] zero-padded to Hp lanes."""
    parts = []
    for g in range(3):
        blk = a[..., g * H:(g + 1) * H]
        pad = jnp.zeros(a.shape[:-1] + (Hp - H,), a.dtype)
        parts.append(jnp.concatenate([blk, pad], axis=-1))
    return jnp.concatenate(parts, axis=-1)


def pack_gru_params(params, lane=128):
    """Repack PyTorch-layout params for the kernel: right-matmul weights with
    gate columns padded to 128-lane boundaries, bf16 MXU operands, and a
    (2, 3Hp) fused bias.  Padding zeros keep padded hidden lanes at exactly 0
    through the recurrence."""
    w_ih, w_hh = params["w_ih"], params["w_hh"]       # (3H, F), (3H, H)
    b_ih, b_hh = params["b_ih"], params["b_hh"]
    H = w_hh.shape[1]
    Hp = ((H + lane - 1) // lane) * lane

    w_ih_p = _pad_gates_last(w_ih.T, H, Hp)                        # (F, 3Hp)
    w_hh_c = _pad_gates_last(w_hh.T, H, Hp)                        # (H, 3Hp)
    w_hh_p = jnp.concatenate(
        [w_hh_c, jnp.zeros((Hp - H, 3 * Hp), w_hh_c.dtype)], axis=0)  # (Hp, 3Hp)
    bias = jnp.stack([_pad_gates_last(b_ih, H, Hp),
                      _pad_gates_last(b_hh, H, Hp)], axis=0)       # (2, 3Hp)

    return {"w_ih": w_ih_p.astype(jnp.bfloat16),
            "w_hh": w_hh_p.astype(jnp.bfloat16),
            "bias": bias.astype(jnp.float32),
            "hidden_dim": int(H),
            "padded_dim": int(Hp)}


# ----------------------------------------------------------------------------
# Pure-JAX f32 reference (PyTorch GRU semantics)
# ----------------------------------------------------------------------------
def gru_reference(x, params):
    W_ih, W_hh = params["w_ih"], params["w_hh"]       # (3H, F), (3H, H)
    b_ih, b_hh = params["b_ih"], params["b_hh"]
    B, S, _ = x.shape
    H = W_hh.shape[1]
    h = jnp.zeros((B, H), jnp.float32)
    for t in range(S):
        gi = x[:, t, :] @ W_ih.T + b_ih
        gh = h @ W_hh.T + b_hh
        r = jax.nn.sigmoid(gi[:, :H] + gh[:, :H])
        z = jax.nn.sigmoid(gi[:, H:2 * H] + gh[:, H:2 * H])
        n = jnp.tanh(gi[:, 2 * H:] + r * gh[:, 2 * H:])
        h = (1.0 - z) * n + z * h
    return h


if __name__ == "__main__":
    batch, seq, num_features, hidden_dim = 2, 8, 4, 32

    key = jax.random.PRNGKey(0)
    k_x, k_p = jax.random.split(key)
    x = jax.random.normal(k_x, (batch, seq, num_features), jnp.float32)
    params = init_gru_params(k_p, num_features, hidden_dim)
    packed = pack_gru_params(params)

    fwd = jax.jit(lambda xx: embed_forward(xx, packed))
    last_hidden, representation = fwd(x)
    jax.block_until_ready((last_hidden, representation))

    assert last_hidden.shape == (1, batch, hidden_dim)
    assert representation.shape == (batch, hidden_dim)

    ref = gru_reference(x, params)
    # bf16 MXU operands (f32 accumulation) -> loosened tolerance vs f32 ref.
    assert jnp.allclose(representation, ref, rtol=3e-2, atol=3e-2), (
        float(jnp.max(jnp.abs(representation - ref))))
    assert jnp.allclose(last_hidden[-1], representation)

    print("KERNEL_OK")
</pallas_src>

<mosaic_0001>
module attributes {stable_mosaic.version = 11 : i64} {
  func.func @gru_kernel(%arg0: i32, %arg1: i32, %arg2: memref<2x8x4xbf16, #tpu.memory_space<vmem>>, %arg3: memref<4x384xbf16, #tpu.memory_space<vmem>>, %arg4: memref<128x384xbf16, #tpu.memory_space<vmem>>, %arg5: memref<2x384xf32, #tpu.memory_space<vmem>>, %arg6: memref<2x128xf32, #tpu.memory_space<vmem>>, %arg7: memref<2x8x384xf32, #tpu.memory_space<vmem>>, %arg8: memref<2x128xf32, #tpu.memory_space<vmem>>) attributes {dimension_semantics = [#tpu.dimension_semantics<parallel>, #tpu.dimension_semantics<arbitrary>], iteration_bounds = array<i64: 1, 1>, scalar_prefetch = 0 : i64, scratch_operands = 2 : i64, tpu.core_type = #tpu.core_type<tc>, window_params = [{transform_indices = @transform_0, window_bounds = array<i64: 2, 8, 4>}, {pipeline_mode = #tpu.pipeline_mode<synchronous>, transform_indices = @transform_1, window_bounds = array<i64: 4, 384>}, {pipeline_mode = #tpu.pipeline_mode<synchronous>, transform_indices = @transform_2, window_bounds = array<i64: 128, 384>}, {pipeline_mode = #tpu.pipeline_mode<synchronous>, transform_indices = @transform_3, window_bounds = array<i64: 2, 384>}, {transform_indices = @transform_4, window_bounds = array<i64: 2, 128>}]} {
    %c0_i32 = arith.constant 0 : i32
    %0 = arith.cmpi eq, %arg1, %c0_i32 : i32
    %1 = arith.extui %0 : i1 to i32
    %c0_i32_0 = arith.constant 0 : i32
    %2 = arith.cmpi ne, %1, %c0_i32_0 : i32
    scf.if %2 {
      %cst_59 = arith.constant 0.000000e+00 : f32
      %223 = vector.broadcast %cst_59 : f32 to vector<2x128xf32>
      %c0_60 = arith.constant 0 : index
      %c0_61 = arith.constant 0 : index
      %224 = vector.load %arg8[%c0_60, %c0_61] : memref<2x128xf32, #tpu.memory_space<vmem>>, vector<2x128xf32>
      tpu.vector_store %arg8[%c0_60, %c0_61], %223 {strides = array<i32>} : memref<2x128xf32, #tpu.memory_space<vmem>>, vector<2x128xf32>,
    } else {
    }
    %c0 = arith.constant 0 : index
    %c0_1 = arith.constant 0 : index
    %3 = vector.load %arg5[%c0, %c0_1] : memref<2x384xf32, #tpu.memory_space<vmem>>, vector<2x384xf32>
    %4 = vector.extract_strided_slice %3 {offsets = [0, 0], sizes = [1, 384], strides = [1, 1]} : vector<2x384xf32> to vector<1x384xf32>
    %5 = vector.shape_cast %4 : vector<1x384xf32> to vector<1x384xf32>
    %6 = vector.broadcast %5 : vector<1x384xf32> to vector<16x384xf32>
    %7 = vector.extract_strided_slice %3 {offsets = [1, 0], sizes = [1, 384], strides = [1, 1]} : vector<2x384xf32> to vector<1x384xf32>
    %8 = vector.shape_cast %7 : vector<1x384xf32> to vector<1x384xf32>
    %9 = vector.broadcast %8 : vector<1x384xf32> to vector<2x384xf32>
    %c0_2 = arith.constant 0 : index
    %c0_3 = arith.constant 0 : index
    %c0_4 = arith.constant 0 : index
    %10 = vector.load %arg2[%c0_2, %c0_3, %c0_4] : memref<2x8x4xbf16, #tpu.memory_space<vmem>>, vector<2x8x4xbf16>
    %11 = vector.shape_cast %10 : vector<2x8x4xbf16> to vector<16x4xbf16>
    %c0_5 = arith.constant 0 : index
    %c0_6 = arith.constant 0 : index
    %12 = vector.load %arg3[%c0_5, %c0_6] : memref<4x384xbf16, #tpu.memory_space<vmem>>, vector<4x384xbf16>
    %cst = arith.constant dense<0.000000e+00> : vector<16x384xf32>
    %13 = tpu.matmul %11, %12, %cst {dimension_numbers = #tpu.dot_dimension_numbers<[1], [0], [0], [1], [0, 0, 1, 1], [], []>} : vector<16x4xbf16>, vector<4x384xbf16>, vector<16x384xf32> -> vector<16x384xf32>
    %14 = arith.addf %13, %6 : vector<16x384xf32>
    %15 = vector.shape_cast %14 : vector<16x384xf32> to vector<2x8x384xf32>
    %c0_7 = arith.constant 0 : index
    %c0_8 = arith.constant 0 : index
    %c0_9 = arith.constant 0 : index
    %16 = vector.load %arg7[%c0_7, %c0_8, %c0_9] : memref<2x8x384xf32, #tpu.memory_space<vmem>>, vector<2x8x384xf32>
    tpu.vector_store %arg7[%c0_7, %c0_8, %c0_9], %15 {strides = array<i32>} : memref<2x8x384xf32, #tpu.memory_space<vmem>>, vector<2x8x384xf32>,
    %c0_10 = arith.constant 0 : index
    %c0_11 = arith.constant 0 : index
    %17 = vector.load %arg4[%c0_10, %c0_11] : memref<128x384xbf16, #tpu.memory_space<vmem>>, vector<128x384xbf16>
    %c0_12 = arith.constant 0 : index
    %c0_13 = arith.constant 0 : index
    %18 = vector.load %arg8[%c0_12, %c0_13] : memref<2x128xf32, #tpu.memory_space<vmem>>, vector<2x128xf32>
    %c0_14 = arith.constant 0 : index
    %c0_15 = arith.constant 0 : index
    %c0_16 = arith.constant 0 : index
    %19 = vector.load %arg7[%c0_14, %c0_15, %c0_16] : memref<2x8x384xf32, #tpu.memory_space<vmem>>, vector<2x1x384xf32>
    %20 = vector.shape_cast %19 : vector<2x1x384xf32> to vector<2x384xf32>
    %21 = arith.truncf %18 : vector<2x128xf32> to vector<2x128xbf16>
    %cst_17 = arith.constant dense<0.000000e+00> : vector<2x384xf32>
    %22 = tpu.matmul %21, %17, %cst_17 {dimension_numbers = #tpu.dot_dimension_numbers<[1], [0], [0], [1], [0, 0, 1, 1], [], []>} : vector<2x128xbf16>, vector<128x384xbf16>, vector<2x384xf32> -> vector<2x384xf32>
    %23 = arith.addf %22, %9 : vector<2x384xf32>
    %24 = vector.extract_strided_slice %20 {offsets = [0, 0], sizes = [2, 256], strides = [1, 1]} : vector<2x384xf32> to vector<2x256xf32>
    %25 = vector.extract_strided_slice %23 {offsets = [0, 0], sizes = [2, 256], strides = [1, 1]} : vector<2x384xf32> to vector<2x256xf32>
    %26 = arith.addf %24, %25 : vector<2x256xf32>
    %27 = arith.negf %26 : vector<2x256xf32>
    %28 = math.exp %27 : vector<2x256xf32>
    %cst_18 = arith.constant 1.000000e+00 : f32
    %29 = vector.broadcast %cst_18 : f32 to vector<2x256xf32>
    %30 = arith.addf %29, %28 : vector<2x256xf32>
    %31 = arith.divf %29, %30 : vector<2x256xf32>
    %32 = vector.extract_strided_slice %31 {offsets = [0, 0], sizes = [2, 128], strides = [1, 1]} : vector<2x256xf32> to vector<2x128xf32>
    %33 = vector.extract_strided_slice %31 {offsets = [0, 128], sizes = [2, 128], strides = [1, 1]} : vector<2x256xf32> to vector<2x128xf32>
    %34 = vector.extract_strided_slice %20 {offsets = [0, 256], sizes = [2, 128], strides = [1, 1]} : vector<2x384xf32> to vector<2x128xf32>
    %35 = vector.extract_strided_slice %23 {offsets = [0, 256], sizes = [2, 128], strides = [1, 1]} : vector<2x384xf32> to vector<2x128xf32>
    %36 = arith.mulf %32, %35 : vector<2x128xf32>
    %37 = arith.addf %34, %36 : vector<2x128xf32>
    %38 = math.tanh %37 : vector<2x128xf32>
    %cst_19 = arith.constant 1.000000e+00 : f32
    %39 = vector.broadcast %cst_19 : f32 to vector<2x128xf32>
    %40 = arith.subf %39, %33 : vector<2x128xf32>
    %41 = arith.mulf %40, %38 : vector<2x128xf32>
    %42 = arith.mulf %33, %18 : vector<2x128xf32>
    %43 = arith.addf %41, %42 : vector<2x128xf32>
    %c0_20 = arith.constant 0 : index
    %c1 = arith.constant 1 : index
    %c0_21 = arith.constant 0 : index
    %44 = vector.load %arg7[%c0_20, %c1, %c0_21] : memref<2x8x384xf32, #tpu.memory_space<vmem>>, vector<2x1x384xf32>
    %45 = vector.shape_cast %44 : vector<2x1x384xf32> to vector<2x384xf32>
    %46 = arith.truncf %43 : vector<2x128xf32> to vector<2x128xbf16>
    %cst_22 = arith.constant dense<0.000000e+00> : vector<2x384xf32>
    %47 = tpu.matmul %46, %17, %cst_22 {dimension_numbers = #tpu.dot_dimension_numbers<[1], [0], [0], [1], [0, 0, 1, 1], [], []>} : vector<2x128xbf16>, vector<128x384xbf16>, vector<2x384xf32> -> vector<2x384xf32>
    %48 = arith.addf %47, %9 : vector<2x384xf32>
    %49 = vector.extract_strided_slice %45 {offsets = [0, 0], sizes = [2, 256], strides = [1, 1]} : vector<2x384xf32> to vector<2x256xf32>
    %50 = vector.extract_strided_slice %48 {offsets = [0, 0], sizes = [2, 256], strides = [1, 1]} : vector<2x384xf32> to vector<2x256xf32>
    %51 = arith.addf %49, %50 : vector<2x256xf32>
    %52 = arith.negf %51 : vector<2x256xf32>
    %53 = math.exp %52 : vector<2x256xf32>
    %cst_23 = arith.constant 1.000000e+00 : f32
    %54 = vector.broadcast %cst_23 : f32 to vector<2x256xf32>
    %55 = arith.addf %54, %53 : vector<2x256xf32>
    %56 = arith.divf %54, %55 : vector<2x256xf32>
    %57 = vector.extract_strided_slice %56 {offsets = [0, 0], sizes = [2, 128], strides = [1, 1]} : vector<2x256xf32> to vector<2x128xf32>
    %58 = vector.extract_strided_slice %56 {offsets = [0, 128], sizes = [2, 128], strides = [1, 1]} : vector<2x256xf32> to vector<2x128xf32>
    %59 = vector.extract_strided_slice %45 {offsets = [0, 256], sizes = [2, 128], strides = [1, 1]} : vector<2x384xf32> to vector<2x128xf32>
    %60 = vector.extract_strided_slice %48 {offsets = [0, 256], sizes = [2, 128], strides = [1, 1]} : vector<2x384xf32> to vector<2x128xf32>
    %61 = arith.mulf %57, %60 : vector<2x128xf32>
    %62 = arith.addf %59, %61 : vector<2x128xf32>
    %63 = math.tanh %62 : vector<2x128xf32>
    %cst_24 = arith.constant 1.000000e+00 : f32
    %64 = vector.broadcast %cst_24 : f32 to vector<2x128xf32>
    %65 = arith.subf %64, %58 : vector<2x128xf32>
    %66 = arith.mulf %65, %63 : vector<2x128xf32>
    %67 = arith.mulf %58, %43 : vector<2x128xf32>
    %68 = arith.addf %66, %67 : vector<2x128xf32>
    %c0_25 = arith.constant 0 : index
    %c2 = arith.constant 2 : index
    %c0_26 = arith.constant 0 : index
    %69 = vector.load %arg7[%c0_25, %c2, %c0_26] : memref<2x8x384xf32, #tpu.memory_space<vmem>>, vector<2x1x384xf32>
    %70 = vector.shape_cast %69 : vector<2x1x384xf32> to vector<2x384xf32>
    %71 = arith.truncf %68 : vector<2x128xf32> to vector<2x128xbf16>
    %cst_27 = arith.constant dense<0.000000e+00> : vector<2x384xf32>
    %72 = tpu.matmul %71, %17, %cst_27 {dimension_numbers = #tpu.dot_dimension_numbers<[1], [0], [0], [1], [0, 0, 1, 1], [], []>} : vector<2x128xbf16>, vector<128x384xbf16>, vector<2x384xf32> -> vector<2x384xf32>
    %73 = arith.addf %72, %9 : vector<2x384xf32>
    %74 = vector.extract_strided_slice %70 {offsets = [0, 0], sizes = [2, 256], strides = [1, 1]} : vector<2x384xf32> to vector<2x256xf32>
    %75 = vector.extract_strided_slice %73 {offsets = [0, 0], sizes = [2, 256], strides = [1, 1]} : vector<2x384xf32> to vector<2x256xf32>
    %76 = arith.addf %74, %75 : vector<2x256xf32>
    %77 = arith.negf %76 : vector<2x256xf32>
    %78 = math.exp %77 : vector<2x256xf32>
    %cst_28 = arith.constant 1.000000e+00 : f32
    %79 = vector.broadcast %cst_28 : f32 to vector<2x256xf32>
    %80 = arith.addf %79, %78 : vector<2x256xf32>
    %81 = arith.divf %79, %80 : vector<2x256xf32>
    %82 = vector.extract_strided_slice %81 {offsets = [0, 0], sizes = [2, 128], strides = [1, 1]} : vector<2x256xf32> to vector<2x128xf32>
    %83 = vector.extract_strided_slice %81 {offsets = [0, 128], sizes = [2, 128], strides = [1, 1]} : vector<2x256xf32> to vector<2x128xf32>
    %84 = vector.extract_strided_slice %70 {offsets = [0, 256], sizes = [2, 128], strides = [1, 1]} : vector<2x384xf32> to vector<2x128xf32>
    %85 = vector.extract_strided_slice %73 {offsets = [0, 256], sizes = [2, 128], strides = [1, 1]} : vector<2x384xf32> to vector<2x128xf32>
    %86 = arith.mulf %82, %85 : vector<2x128xf32>
    %87 = arith.addf %84, %86 : vector<2x128xf32>
    %88 = math.tanh %87 : vector<2x128xf32>
    %cst_29 = arith.constant 1.000000e+00 : f32
    %89 = vector.broadcast %cst_29 : f32 to vector<2x128xf32>
    %90 = arith.subf %89, %83 : vector<2x128xf32>
    %91 = arith.mulf %90, %88 : vector<2x128xf32>
    %92 = arith.mulf %83, %68 : vector<2x128xf32>
    %93 = arith.addf %91, %92 : vector<2x128xf32>
    %c0_30 = arith.constant 0 : index
    %c3 = arith.constant 3 : index
    %c0_31 = arith.constant 0 : index
    %94 = vector.load %arg7[%c0_30, %c3, %c0_31] : memref<2x8x384xf32, #tpu.memory_space<vmem>>, vector<2x1x384xf32>
    %95 = vector.shape_cast %94 : vector<2x1x384xf32> to vector<2x384xf32>
    %96 = arith.truncf %93 : vector<2x128xf32> to vector<2x128xbf16>
    %cst_32 = arith.constant dense<0.000000e+00> : vector<2x384xf32>
    %97 = tpu.matmul %96, %17, %cst_32 {dimension_numbers = #tpu.dot_dimension_numbers<[1], [0], [0], [1], [0, 0, 1, 1], [], []>} : vector<2x128xbf16>, vector<128x384xbf16>, vector<2x384xf32> -> vector<2x384xf32>
    %98 = arith.addf %97, %9 : vector<2x384xf32>
    %99 = vector.extract_strided_slice %95 {offsets = [0, 0], sizes = [2, 256], strides = [1, 1]} : vector<2x384xf32> to vector<2x256xf32>
    %100 = vector.extract_strided_slice %98 {offsets = [0, 0], sizes = [2, 256], strides = [1, 1]} : vector<2x384xf32> to vector<2x256xf32>
    %101 = arith.addf %99, %100 : vector<2x256xf32>
    %102 = arith.negf %101 : vector<2x256xf32>
    %103 = math.exp %102 : vector<2x256xf32>
    %cst_33 = arith.constant 1.000000e+00 : f32
    %104 = vector.broadcast %cst_33 : f32 to vector<2x256xf32>
    %105 = arith.addf %104, %103 : vector<2x256xf32>
    %106 = arith.divf %104, %105 : vector<2x256xf32>
    %107 = vector.extract_strided_slice %106 {offsets = [0, 0], sizes = [2, 128], strides = [1, 1]} : vector<2x256xf32> to vector<2x128xf32>
    %108 = vector.extract_strided_slice %106 {offsets = [0, 128], sizes = [2, 128], strides = [1, 1]} : vector<2x256xf32> to vector<2x128xf32>
    %109 = vector.extract_strided_slice %95 {offsets = [0, 256], sizes = [2, 128], strides = [1, 1]} : vector<2x384xf32> to vector<2x128xf32>
    %110 = vector.extract_strided_slice %98 {offsets = [0, 256], sizes = [2, 128], strides = [1, 1]} : vector<2x384xf32> to vector<2x128xf32>
    %111 = arith.mulf %107, %110 : vector<2x128xf32>
    %112 = arith.addf %109, %111 : vector<2x128xf32>
    %113 = math.tanh %112 : vector<2x128xf32>
    %cst_34 = arith.constant 1.000000e+00 : f32
    %114 = vector.broadcast %cst_34 : f32 to vector<2x128xf32>
    %115 = arith.subf %114, %108 : vector<2x128xf32>
    %116 = arith.mulf %115, %113 : vector<2x128xf32>
    %117 = arith.mulf %108, %93 : vector<2x128xf32>
    %118 = arith.addf %116, %117 : vector<2x128xf32>
    %c0_35 = arith.constant 0 : index
    %c4 = arith.constant 4 : index
    %c0_36 = arith.constant 0 : index
    %119 = vector.load %arg7[%c0_35, %c4, %c0_36] : memref<2x8x384xf32, #tpu.memory_space<vmem>>, vector<2x1x384xf32>
    %120 = vector.shape_cast %119 : vector<2x1x384xf32> to vector<2x384xf32>
    %121 = arith.truncf %118 : vector<2x128xf32> to vector<2x128xbf16>
    %cst_37 = arith.constant dense<0.000000e+00> : vector<2x384xf32>
    %122 = tpu.matmul %121, %17, %cst_37 {dimension_numbers = #tpu.dot_dimension_numbers<[1], [0], [0], [1], [0, 0, 1, 1], [], []>} : vector<2x128xbf16>, vector<128x384xbf16>, vector<2x384xf32> -> vector<2x384xf32>
    %123 = arith.addf %122, %9 : vector<2x384xf32>
    %124 = vector.extract_strided_slice %120 {offsets = [0, 0], sizes = [2, 256], strides = [1, 1]} : vector<2x384xf32> to vector<2x256xf32>
    %125 = vector.extract_strided_slice %123 {offsets = [0, 0], sizes = [2, 256], strides = [1, 1]} : vector<2x384xf32> to vector<2x256xf32>
    %126 = arith.addf %124, %125 : vector<2x256xf32>
    %127 = arith.negf %126 : vector<2x256xf32>
    %128 = math.exp %127 : vector<2x256xf32>
    %cst_38 = arith.constant 1.000000e+00 : f32
    %129 = vector.broadcast %cst_38 : f32 to vector<2x256xf32>
    %130 = arith.addf %129, %128 : vector<2x256xf32>
    %131 = arith.divf %129, %130 : vector<2x256xf32>
    %132 = vector.extract_strided_slice %131 {offsets = [0, 0], sizes = [2, 128], strides = [1, 1]} : vector<2x256xf32> to vector<2x128xf32>
    %133 = vector.extract_strided_slice %131 {offsets = [0, 128], sizes = [2, 128], strides = [1, 1]} : vector<2x256xf32> to vector<2x128xf32>
    %134 = vector.extract_strided_slice %120 {offsets = [0, 256], sizes = [2, 128], strides = [1, 1]} : vector<2x384xf32> to vector<2x128xf32>
    %135 = vector.extract_strided_slice %123 {offsets = [0, 256], sizes = [2, 128], strides = [1, 1]} : vector<2x384xf32> to vector<2x128xf32>
    %136 = arith.mulf %132, %135 : vector<2x128xf32>
    %137 = arith.addf %134, %136 : vector<2x128xf32>
    %138 = math.tanh %137 : vector<2x128xf32>
    %cst_39 = arith.constant 1.000000e+00 : f32
    %139 = vector.broadcast %cst_39 : f32 to vector<2x128xf32>
    %140 = arith.subf %139, %133 : vector<2x128xf32>
    %141 = arith.mulf %140, %138 : vector<2x128xf32>
    %142 = arith.mulf %133, %118 : vector<2x128xf32>
    %143 = arith.addf %141, %142 : vector<2x128xf32>
    %c0_40 = arith.constant 0 : index
    %c5 = arith.constant 5 : index
    %c0_41 = arith.constant 0 : index
    %144 = vector.load %arg7[%c0_40, %c5, %c0_41] : memref<2x8x384xf32, #tpu.memory_space<vmem>>, vector<2x1x384xf32>
    %145 = vector.shape_cast %144 : vector<2x1x384xf32> to vector<2x384xf32>
    %146 = arith.truncf %143 : vector<2x128xf32> to vector<2x128xbf16>
    %cst_42 = arith.constant dense<0.000000e+00> : vector<2x384xf32>
    %147 = tpu.matmul %146, %17, %cst_42 {dimension_numbers = #tpu.dot_dimension_numbers<[1], [0], [0], [1], [0, 0, 1, 1], [], []>} : vector<2x128xbf16>, vector<128x384xbf16>, vector<2x384xf32> -> vector<2x384xf32>
    %148 = arith.addf %147, %9 : vector<2x384xf32>
    %149 = vector.extract_strided_slice %145 {offsets = [0, 0], sizes = [2, 256], strides = [1, 1]} : vector<2x384xf32> to vector<2x256xf32>
    %150 = vector.extract_strided_slice %148 {offsets = [0, 0], sizes = [2, 256], strides = [1, 1]} : vector<2x384xf32> to vector<2x256xf32>
    %151 = arith.addf %149, %150 : vector<2x256xf32>
    %152 = arith.negf %151 : vector<2x256xf32>
    %153 = math.exp %152 : vector<2x256xf32>
    %cst_43 = arith.constant 1.000000e+00 : f32
    %154 = vector.broadcast %cst_43 : f32 to vector<2x256xf32>
    %155 = arith.addf %154, %153 : vector<2x256xf32>
    %156 = arith.divf %154, %155 : vector<2x256xf32>
    %157 = vector.extract_strided_slice %156 {offsets = [0, 0], sizes = [2, 128], strides = [1, 1]} : vector<2x256xf32> to vector<2x128xf32>
    %158 = vector.extract_strided_slice %156 {offsets = [0, 128], sizes = [2, 128], strides = [1, 1]} : vector<2x256xf32> to vector<2x128xf32>
    %159 = vector.extract_strided_slice %145 {offsets = [0, 256], sizes = [2, 128], strides = [1, 1]} : vector<2x384xf32> to vector<2x128xf32>
    %160 = vector.extract_strided_slice %148 {offsets = [0, 256], sizes = [2, 128], strides = [1, 1]} : vector<2x384xf32> to vector<2x128xf32>
    %161 = arith.mulf %157, %160 : vector<2x128xf32>
    %162 = arith.addf %159, %161 : vector<2x128xf32>
    %163 = math.tanh %162 : vector<2x128xf32>
    %cst_44 = arith.constant 1.000000e+00 : f32
    %164 = vector.broadcast %cst_44 : f32 to vector<2x128xf32>
    %165 = arith.subf %164, %158 : vector<2x128xf32>
    %166 = arith.mulf %165, %163 : vector<2x128xf32>
    %167 = arith.mulf %158, %143 : vector<2x128xf32>
    %168 = arith.addf %166, %167 : vector<2x128xf32>
    %c0_45 = arith.constant 0 : index
    %c6 = arith.constant 6 : index
    %c0_46 = arith.constant 0 : index
    %169 = vector.load %arg7[%c0_45, %c6, %c0_46] : memref<2x8x384xf32, #tpu.memory_space<vmem>>, vector<2x1x384xf32>
    %170 = vector.shape_cast %169 : vector<2x1x384xf32> to vector<2x384xf32>
    %171 = arith.truncf %168 : vector<2x128xf32> to vector<2x128xbf16>
    %cst_47 = arith.constant dense<0.000000e+00> : vector<2x384xf32>
    %172 = tpu.matmul %171, %17, %cst_47 {dimension_numbers = #tpu.dot_dimension_numbers<[1], [0], [0], [1], [0, 0, 1, 1], [], []>} : vector<2x128xbf16>, vector<128x384xbf16>, vector<2x384xf32> -> vector<2x384xf32>
    %173 = arith.addf %172, %9 : vector<2x384xf32>
    %174 = vector.extract_strided_slice %170 {offsets = [0, 0], sizes = [2, 256], strides = [1, 1]} : vector<2x384xf32> to vector<2x256xf32>
    %175 = vector.extract_strided_slice %173 {offsets = [0, 0], sizes = [2, 256], strides = [1, 1]} : vector<2x384xf32> to vector<2x256xf32>
    %176 = arith.addf %174, %175 : vector<2x256xf32>
    %177 = arith.negf %176 : vector<2x256xf32>
    %178 = math.exp %177 : vector<2x256xf32>
    %cst_48 = arith.constant 1.000000e+00 : f32
    %179 = vector.broadcast %cst_48 : f32 to vector<2x256xf32>
    %180 = arith.addf %179, %178 : vector<2x256xf32>
    %181 = arith.divf %179, %180 : vector<2x256xf32>
    %182 = vector.extract_strided_slice %181 {offsets = [0, 0], sizes = [2, 128], strides = [1, 1]} : vector<2x256xf32> to vector<2x128xf32>
    %183 = vector.extract_strided_slice %181 {offsets = [0, 128], sizes = [2, 128], strides = [1, 1]} : vector<2x256xf32> to vector<2x128xf32>
    %184 = vector.extract_strided_slice %170 {offsets = [0, 256], sizes = [2, 128], strides = [1, 1]} : vector<2x384xf32> to vector<2x128xf32>
    %185 = vector.extract_strided_slice %173 {offsets = [0, 256], sizes = [2, 128], strides = [1, 1]} : vector<2x384xf32> to vector<2x128xf32>
    %186 = arith.mulf %182, %185 : vector<2x128xf32>
    %187 = arith.addf %184, %186 : vector<2x128xf32>
    %188 = math.tanh %187 : vector<2x128xf32>
    %cst_49 = arith.constant 1.000000e+00 : f32
    %189 = vector.broadcast %cst_49 : f32 to vector<2x128xf32>
    %190 = arith.subf %189, %183 : vector<2x128xf32>
    %191 = arith.mulf %190, %188 : vector<2x128xf32>
    %192 = arith.mulf %183, %168 : vector<2x128xf32>
    %193 = arith.addf %191, %192 : vector<2x128xf32>
    %c0_50 = arith.constant 0 : index
    %c7 = arith.constant 7 : index
    %c0_51 = arith.constant 0 : index
    %194 = vector.load %arg7[%c0_50, %c7, %c0_51] : memref<2x8x384xf32, #tpu.memory_space<vmem>>, vector<2x1x384xf32>
    %195 = vector.shape_cast %194 : vector<2x1x384xf32> to vector<2x384xf32>
    %196 = arith.truncf %193 : vector<2x128xf32> to vector<2x128xbf16>
    %cst_52 = arith.constant dense<0.000000e+00> : vector<2x384xf32>
    %197 = tpu.matmul %196, %17, %cst_52 {dimension_numbers = #tpu.dot_dimension_numbers<[1], [0], [0], [1], [0, 0, 1, 1], [], []>} : vector<2x128xbf16>, vector<128x384xbf16>, vector<2x384xf32> -> vector<2x384xf32>
    %198 = arith.addf %197, %9 : vector<2x384xf32>
    %199 = vector.extract_strided_slice %195 {offsets = [0, 0], sizes = [2, 256], strides = [1, 1]} : vector<2x384xf32> to vector<2x256xf32>
    %200 = vector.extract_strided_slice %198 {offsets = [0, 0], sizes = [2, 256], strides = [1, 1]} : vector<2x384xf32> to vector<2x256xf32>
    %201 = arith.addf %199, %200 : vector<2x256xf32>
    %202 = arith.negf %201 : vector<2x256xf32>
    %203 = math.exp %202 : vector<2x256xf32>
    %cst_53 = arith.constant 1.000000e+00 : f32
    %204 = vector.broadcast %cst_53 : f32 to vector<2x256xf32>
    %205 = arith.addf %204, %203 : vector<2x256xf32>
    %206 = arith.divf %204, %205 : vector<2x256xf32>
    %207 = vector.extract_strided_slice %206 {offsets = [0, 0], sizes = [2, 128], strides = [1, 1]} : vector<2x256xf32> to vector<2x128xf32>
    %208 = vector.extract_strided_slice %206 {offsets = [0, 128], sizes = [2, 128], strides = [1, 1]} : vector<2x256xf32> to vector<2x128xf32>
    %209 = vector.extract_strided_slice %195 {offsets = [0, 256], sizes = [2, 128], strides = [1, 1]} : vector<2x384xf32> to vector<2x128xf32>
    %210 = vector.extract_strided_slice %198 {offsets = [0, 256], sizes = [2, 128], strides = [1, 1]} : vector<2x384xf32> to vector<2x128xf32>
    %211 = arith.mulf %207, %210 : vector<2x128xf32>
    %212 = arith.addf %209, %211 : vector<2x128xf32>
    %213 = math.tanh %212 : vector<2x128xf32>
    %cst_54 = arith.constant 1.000000e+00 : f32
    %214 = vector.broadcast %cst_54 : f32 to vector<2x128xf32>
    %215 = arith.subf %214, %208 : vector<2x128xf32>
    %216 = arith.mulf %215, %213 : vector<2x128xf32>
    %217 = arith.mulf %208, %193 : vector<2x128xf32>
    %218 = arith.addf %216, %217 : vector<2x128xf32>
    %c0_55 = arith.constant 0 : index
    %c0_56 = arith.constant 0 : index
    %219 = vector.load %arg8[%c0_55, %c0_56] : memref<2x128xf32, #tpu.memory_space<vmem>>, vector<2x128xf32>
    tpu.vector_store %arg8[%c0_55, %c0_56], %218 {strides = array<i32>} : memref<2x128xf32, #tpu.memory_space<vmem>>, vector<2x128xf32>,
    %c0_i32_57 = arith.constant 0 : i32
    %220 = arith.cmpi eq, %arg1, %c0_i32_57 : i32
    %221 = arith.extui %220 : i1 to i32
    %c0_i32_58 = arith.constant 0 : i32
    %222 = arith.cmpi ne, %221, %c0_i32_58 : i32
    scf.if %222 {
      %c0_59 = arith.constant 0 : index
      %c0_60 = arith.constant 0 : index
      %223 = vector.load %arg8[%c0_59, %c0_60] : memref<2x128xf32, #tpu.memory_space<vmem>>, vector<2x128xf32>
      %c0_61 = arith.constant 0 : index
      %c0_62 = arith.constant 0 : index
      %224 = vector.load %arg6[%c0_61, %c0_62] : memref<2x128xf32, #tpu.memory_space<vmem>>, vector<2x128xf32>
      tpu.vector_store %arg6[%c0_61, %c0_62], %223 {strides = array<i32>} : memref<2x128xf32, #tpu.memory_space<vmem>>, vector<2x128xf32>,
    } else {
    }
    return
  }
  func.func @transform_0(%arg0: i32, %arg1: i32) -> (i32, i32, i32) {
    %c0_i32 = arith.constant 0 : i32
    %c0_i32_0 = arith.constant 0 : i32
    return %arg0, %arg1, %c0_i32 : i32, i32, i32
  }
  func.func @transform_1(%arg0: i32, %arg1: i32) -> (i32, i32) {
    %c0_i32 = arith.constant 0 : i32
    %c0_i32_0 = arith.constant 0 : i32
    %c0_i32_1 = arith.constant 0 : i32
    return %c0_i32, %c0_i32_0 : i32, i32
  }
  func.func @transform_2(%arg0: i32, %arg1: i32) -> (i32, i32) {
    %c0_i32 = arith.constant 0 : i32
    %c0_i32_0 = arith.constant 0 : i32
    %c0_i32_1 = arith.constant 0 : i32
    return %c0_i32, %c0_i32_0 : i32, i32
  }
  func.func @transform_3(%arg0: i32, %arg1: i32) -> (i32, i32) {
    %c0_i32 = arith.constant 0 : i32
    %c0_i32_0 = arith.constant 0 : i32
    %c0_i32_1 = arith.constant 0 : i32
    return %c0_i32, %c0_i32_0 : i32, i32
  }
  func.func @transform_4(%arg0: i32, %arg1: i32) -> (i32, i32) {
    %c0_i32 = arith.constant 0 : i32
    %c0_i32_0 = arith.constant 0 : i32
    return %arg0, %c0_i32 : i32, i32
  }
}

</mosaic_0001>

<bundles_post_ra>
// kernel: _lambda_.1
= control target key start
LH: loop header
LB: loop body
LE: loop exit
PB: predicated region body
PF: predicated region fallthrough
CT: control target
= control target key end

     0   :  { %9 = vsyncpa [#allocation5], 0  ;;  %s1615_s18 = smov [#allocation4]   ;;  %s1616_s20 = smov 192   ;;  %s2034_s0 = inlined_call_operand.vmem [shape: bf16[2,8,4], index: 0, kind: input, shape index: {}]   ;;  %s2035_s1 = inlined_call_operand.vmem [shape: bf16[4,384], index: 1, kind: input, shape index: {}]   ;;  %s2036_s2 = inlined_call_operand.hbm [shape: bf16[128,384], index: 2, kind: input, shape index: {}]   ;;  %s2037_s3 = inlined_call_operand.vmem [shape: f32[2,384], index: 3, kind: input, shape index: {}]   ;;  %s2038_s4 = inlined_call_operand.vmem [shape: f32[2,128], index: 4, kind: output, shape index: {}]  }
   0x1   :  { %s18_s17 = sshll.u32 %s2036_s2, 4  ;;  %s20_s19 = sshll.u32 %s1615_s18, 4  ;;  %s19_s17 = int_to_ptr.hbm [resolvable:$true] %s18_s17  ;;  %s21_s19 = int_to_ptr.vmem [resolvable:$true] %s20_s19 }
   0x2   :  { %s1617_s21 = smov 12  }
   0x3   :  { %26 = dma.hbm_to_vmem [thread:$0]  %s19_s17, 3072, %s21_s19, [#allocation5], %s1616_s20, %s1616_s20, %s1617_s21  }
   0x4   :  { %1613 = dma.done.wait [#allocation5], 3072  }
   0x5   :  { %1614 = vsyncadd [#allocation5], 4294964224  ;;  %v1618_v0 = vmov 0.0   ;;  %v1438_v1 = vld [vmem:[#allocation4 + $0xa8] sm:$0xf]  ;;  %vm76_vm0 = vcmask 1041408  }
   0x6   :  { %38 = vst [vmem:[#allocation3] sm:$0x3] %v1618_v0  ;;  %v1487_v2 = vld [vmem:[#allocation4 + $0xb0] sm:$0xf0]  ;;  %v1426_v3 = vld [vmem:[#allocation4 + $0x90] sm:$0xf] }
   0x7   :  { %v1647_v4 = vor.u32 %v1487_v2, %v1438_v1  ;;  %v1484_v5 = vld [vmem:[#allocation4 + $0x98] sm:$0xf0]  ;;  %v61_v6 = vld [vmem:[%s2035_s1] sm:$0x3f]  ;;  %v1414_v8 = vld [vmem:[#allocation4 + $0x78] sm:$0xf] }
   0x8   :  { %68 = vst [vmem:[#allocation1] ss:$4 sm:$0xff] %v61_v6  ;;  %v1653_v7 = vor.u32 %v1484_v5, %v1426_v3  ;;  %v1481_v9 = vld [vmem:[#allocation4 + $0x80] sm:$0xf0]  ;;  %v1486_v10 = vld [vmem:[#allocation4 + $0xac] sm:$0xf] }
   0x9   :  { %296 = vmatpush.bf16.msra.mxu3 %v1647_v4  ;;  %v1440_v11 = vld [vmem:[#allocation4 + $0xb4] sm:$0xf0]  ;;  %v1402_v12 = vld [vmem:[#allocation4 + $0x60] sm:$0xf]  ;;  %v1656_v13 = vor.u32 %v1481_v9, %v1414_v8  ;;  %v1478_v15 = vld [vmem:[#allocation4 + $0x68] sm:$0xf0] }
   0xa   :  { %v1658_v14 = vor.u32 %v1486_v10, %v1440_v11  ;;  %v1483_v16 = vld [vmem:[#allocation4 + $0x94] sm:$0xf]  ;;  %v1428_v17 = vld [vmem:[#allocation4 + $0x9c] sm:$0xf0]  ;;  %v1464_v22 = vld [vmem:[%s2034_s0] sm:$0xff]  ;;  %vm72_vm1 = vcmask 31744   ;;  %v1668_v25 = vor.u32 %v1478_v15, %v1402_v12 }
   0xb   :  { %v1670_v26 = vor.u32 %v1483_v16, %v1428_v17  ;;  %v1390_v27 = vld [vmem:[#allocation4 + $0x48] sm:$0xf]  ;;  %v1475_v28 = vld [vmem:[#allocation4 + $0x50] sm:$0xf0]  ;;  %v1480_v29 = vld [vmem:[#allocation4 + $0x7c] sm:$0xf] }
   0xc   :  { %v1416_v30 = vld [vmem:[#allocation4 + $0x84] sm:$0xf0]  ;;  %v1446_v31 = vld [vmem:[#allocation4 + $0xb0] sm:$0xf]  ;;  %v1488_v32 = vld [vmem:[#allocation4 + $0xb8] sm:$0xf0]  ;;  %v1679_v36 = vor.u32 %v1475_v28, %v1390_v27 }
   0xd   :  { %297 = vmatpush.bf16.msra.mxu3 %v1653_v7  ;;  %v1675_v33 = vor.u32 %v1488_v32, %v1446_v31  ;;  %v1434_v34 = vld [vmem:[#allocation4 + $0x98] sm:$0xf]  ;;  %v1485_v35 = vld [vmem:[#allocation4 + $0xa0] sm:$0xf0]  ;;  %v1681_v37 = vor.u32 %v1480_v29, %v1416_v30  ;;  %v1378_v38 = vld [vmem:[#allocation4 + $0x30] sm:$0xf] }
   0xe   :  { %v1472_v39 = vld [vmem:[#allocation4 + $0x38] sm:$0xf0]  ;;  %v1477_v40 = vld [vmem:[#allocation4 + $0x64] sm:$0xf]  ;;  %v1404_v41 = vld [vmem:[#allocation4 + $0x6c] sm:$0xf0]  ;;  %v1686_v42 = vor.u32 %v1485_v35, %v1434_v34 }
   0xf   :  { %v69_v18 = vld.sshfl [vmem:[#allocation1] sm:$0xff pattern:$0x73625140]  ;;  %v71_v19 = vld.sshfl [vmem:[#allocation1 + $0x10] sm:$0xff pattern:$0x73625140]  ;;  %v1690_v45 = vor.u32 %v1472_v39, %v1378_v38  ;;  %v1692_v46 = vor.u32 %v1477_v40, %v1404_v41 }
  0x10   :  { %v77_v20 = vsel %vm76_vm0, %v69_v18, 0  ;;  %v81_v21 = vsel %vm76_vm0, %v71_v19, 0  ;;  %v70_v23 = vld.sshfl [vmem:[#allocation1 + $0x8] sm:$0xff pattern:$0x73625140]  ;;  %vm338_vm2 = vcmask 1040384  }
  0x11   :  { %90 = vmatpush.bf16.msra.mxu0 %v77_v20  ;;  %118 = vmatpush.bf16.msra.mxu2 %v81_v21  ;;  %v79_v24 = vsel %vm76_vm0, %v70_v23, 0  ;;  %v1422_v43 = vld [vmem:[#allocation4 + $0x80] sm:$0xf]  ;;  %v1482_v44 = vld [vmem:[#allocation4 + $0x88] sm:$0xf0]  ;;  %vm340_vm3 = vcmask 1041409  }
  0x12   :  { %298 = vmatpush.bf16.msra.mxu3 %v1656_v13  ;;  %104 = vmatpush.bf16.msra.mxu1 %v79_v24  ;;  %v1366_v47 = vld [vmem:[#allocation4 + $0x18] sm:$0xf]  ;;  %v1469_v48 = vld [vmem:[#allocation4 + $0x20] sm:$0xf0]  ;;  %v1474_v49 = vld [vmem:[#allocation4 + $0x4c] sm:$0xf]  ;;  %v1696_v51 = vor.u32 %v1482_v44, %v1422_v43 }
  0x13   :  { %v1392_v50 = vld [vmem:[#allocation4 + $0x54] sm:$0xf0]  ;;  %v1410_v52 = vld [vmem:[#allocation4 + $0x68] sm:$0xf]  ;;  %v1479_v53 = vld [vmem:[#allocation4 + $0x70] sm:$0xf0]  ;;  %v1700_v54 = vor.u32 %v1469_v48, %v1366_v47 }
  0x14   :  { %1351 = vmatmul.msk.bf16.vlgmr.msra.gmra.mxu2 %vm72_vm1, %v1464_v22  ;;  %1349 = vmatmul.msk.bf16.vlgmr.msra.gmra.mxu0 %vm72_vm1, %v1464_v22  ;;  %v1702_v55 = vor.u32 %v1474_v49, %v1392_v50  ;;  %v1354_v56 = vld [vmem:[#allocation4] sm:$0xf]  ;;  %v1466_v57 = vld [vmem:[#allocation4 + $0x8] sm:$0xf0]  ;;  %v1471_v58 = vld [vmem:[#allocation4 + $0x34] sm:$0xf]  ;;  %v1706_v60 = vor.u32 %v1479_v53, %v1410_v52 }
  0x15   :  { %309 = vmatpush.bf16.msrb.mxu0 %v1658_v14  ;;  %431 = vmatpush.bf16.msrb.mxu2 %v1647_v4  ;;  %v1380_v59 = vld [vmem:[#allocation4 + $0x3c] sm:$0xf0]  ;;  %v1398_v61 = vld [vmem:[#allocation4 + $0x50] sm:$0xf]  ;;  %v1476_v62 = vld [vmem:[#allocation4 + $0x58] sm:$0xf0]  ;;  %v1710_v63 = vor.u32 %v1466_v57, %v1354_v56 }
  0x16   :  { %299 = vmatpush.bf16.msra.mxu3 %v1668_v25  ;;  %1350 = vmatmul.msk.bf16.vlgmr.msra.gmra.mxu1 %vm72_vm1, %v1464_v22  ;;  %v1712_v0 = vor.u32 %v1471_v58, %v1380_v59  ;;  %v1714_v1 = vld [vmem:[#allocation3] sm:$0x3]  ;;  %v1368_v3 = vld [vmem:[#allocation4 + $0x24] sm:$0xf0]  ;;  %v1718_v5 = vor.u32 %v1476_v62, %v1398_v61  ;;  %v1386_v8 = vld [vmem:[#allocation4 + $0x38] sm:$0xf] }
  0x17   :  { %322 = vmatpush.bf16.msrb.mxu1 %v1675_v33  ;;  %v1468_v2 = vld [vmem:[#allocation4 + $0x1c] sm:$0xf]  ;;  %v167_v6 = vpack.c.bf16 %v1714_v1, %v1714_v1  ;;  %v1473_v9 = vld [vmem:[#allocation4 + $0x40] sm:$0xf0]  ;;  %v1356_v12 = vld [vmem:[#allocation4 + $0xc] sm:$0xf0] }
  0x18   :  { %v1724_v10 = vor.u32 %v1468_v2, %v1368_v3  ;;  %v1465_v11 = vld [vmem:[#allocation4 + $0x4] sm:$0xf]  ;;  %v1729_v15 = vor.u32 %v1473_v9, %v1386_v8  ;;  %v1374_v16 = vld [vmem:[#allocation4 + $0x20] sm:$0xf]  ;;  %v1470_v17 = vld [vmem:[#allocation4 + $0x28] sm:$0xf0] }
  0x19   :  { %310 = vmatpush.bf16.msrb.mxu0 %v1670_v26  ;;  %432 = vmatpush.bf16.msrb.mxu2 %v1653_v7  ;;  %v1732_v18 = vor.u32 %v1465_v11, %v1356_v12  ;;  %v1737_v19 = vor.u32 %v1470_v17, %v1374_v16  ;;  %v1362_v20 = vld [vmem:[#allocation4 + $0x8] sm:$0xf]  ;;  %v1467_v21 = vld [vmem:[#allocation4 + $0x10] sm:$0xf0] }
  0x1a   :  { %300 = vmatpush.bf16.msra.mxu3 %v1679_v36  ;;  %v1743_v22 = vor.u32 %v1467_v21, %v1362_v20  ;;  %v39_v23 = vld [vmem:[%s2037_s3] sm:$0x3f] }
  0x1b   :  { %323 = vmatpush.bf16.msrb.mxu1 %v1686_v42  ;;  %v41_v24 = vperm.slane %v39_v23, 0  ;;  %v42_v27 = vperm.slane %v39_v23, 2  ;;  %v43_v29 = vperm.slane %v39_v23, 4  ;;  %v50_v50 = vperm.slane %v39_v23, 1 }
  0x1c   :  { %v51_v52 = vperm.slane %v39_v23, 3 }
  0x1d   :  { %311 = vmatpush.bf16.msrb.mxu0 %v1681_v37  ;;  %433 = vmatpush.bf16.msrb.mxu2 %v1656_v13  ;;  %v47_v28 = vperm.slane %v41_v24, 0  ;;  %v48_v31 = vperm.slane %v42_v27, 0  ;;  %v49_v35 = vperm.slane %v43_v29, 0  ;;  %v1802_v53 = vperm.slane %v50_v50, 1 }
  0x1e   :  { %301 = vmatpush.bf16.msra.mxu3 %v1690_v45  ;;  %v1804_v56 = vperm.slane %v51_v52, 1 }
  0x1f   :  { %324 = vmatpush.bf16.msrb.mxu1 %v1696_v51 }
  0x21   :  { %312 = vmatpush.bf16.msrb.mxu0 %v1692_v46  ;;  %434 = vmatpush.bf16.msrb.mxu2 %v1668_v25 }
  0x22   :  { %302 = vmatpush.bf16.msra.mxu3 %v1700_v54 }
  0x23   :  { %325 = vmatpush.bf16.msrb.mxu1 %v1706_v60 }
  0x25   :  { %313 = vmatpush.bf16.msrb.mxu0 %v1702_v55  ;;  %435 = vmatpush.bf16.msrb.mxu2 %v1679_v36 }
  0x26   :  { %303 = vmatpush.bf16.msra.mxu3 %v1710_v63 }
  0x27   :  { %326 = vmatpush.bf16.msrb.mxu1 %v1718_v5 }
  0x29   :  { %314 = vmatpush.bf16.msrb.mxu0 %v1712_v0  ;;  %436 = vmatpush.bf16.msrb.mxu2 %v1690_v45 }
  0x2a   :  { %444 = vmatpush.bf16.msrb.mxu3 %v1658_v14 }
  0x2b   :  { %304 = vmatmul.bf16.vlgmr.msra.gmra.mxu3 %v167_v6  ;;  %327 = vmatpush.bf16.msrb.mxu1 %v1729_v15 }
  0x2d   :  { %315 = vmatpush.bf16.msrb.mxu0 %v1724_v10  ;;  %437 = vmatpush.bf16.msrb.mxu2 %v1700_v54 }
  0x2e   :  { %445 = vmatpush.bf16.msrb.mxu3 %v1670_v26 }
  0x2f   :  { %328 = vmatpush.bf16.msrb.mxu1 %v1737_v19 }
  0x31   :  { %316 = vmatpush.bf16.msrb.mxu0 %v1732_v18  ;;  %438 = vmatpush.bf16.msrb.mxu2 %v1710_v63 }
  0x32   :  { %446 = vmatpush.bf16.msrb.mxu3 %v1681_v37 }
  0x33   :  { %329 = vmatpush.bf16.msrb.mxu1 %v1743_v22 }
  0x34   :  { %317 = vmatmul.bf16.vlgmr.msrb.gmra.mxu0 %v167_v6 }
  0x35   :  { %457 = vmatpush.bf16.msra.mxu0 %v1675_v33  ;;  %574 = vmatpush.bf16.msra.mxu2 %v1658_v14 }
  0x36   :  { %447 = vmatpush.bf16.msrb.mxu3 %v1692_v46  ;;  %330 = vmatmul.bf16.vlgmr.msrb.gmra.mxu1 %v167_v6 }
  0x37   :  { %561 = vmatpush.bf16.msra.mxu1 %v1647_v4 }
  0x39   :  { %458 = vmatpush.bf16.msra.mxu0 %v1686_v42  ;;  %575 = vmatpush.bf16.msra.mxu2 %v1670_v26 }
  0x3a   :  { %448 = vmatpush.bf16.msrb.mxu3 %v1702_v55 }
  0x3b   :  { %562 = vmatpush.bf16.msra.mxu1 %v1653_v7 }
  0x3d   :  { %459 = vmatpush.bf16.msra.mxu0 %v1696_v51  ;;  %576 = vmatpush.bf16.msra.mxu2 %v1681_v37 }
  0x3e   :  { %449 = vmatpush.bf16.msrb.mxu3 %v1712_v0 }
  0x3f   :  { %563 = vmatpush.bf16.msra.mxu1 %v1656_v13 }
  0x41   :  { %460 = vmatpush.bf16.msra.mxu0 %v1706_v60  ;;  %577 = vmatpush.bf16.msra.mxu2 %v1692_v46 }
  0x42   :  { %450 = vmatpush.bf16.msrb.mxu3 %v1724_v10 }
  0x43   :  { %564 = vmatpush.bf16.msra.mxu1 %v1668_v25 }
  0x45   :  { %461 = vmatpush.bf16.msra.mxu0 %v1718_v5  ;;  %578 = vmatpush.bf16.msra.mxu2 %v1702_v55 }
  0x46   :  { %451 = vmatpush.bf16.msrb.mxu3 %v1732_v18 }
  0x47   :  { %565 = vmatpush.bf16.msra.mxu1 %v1679_v36 }
  0x49   :  { %462 = vmatpush.bf16.msra.mxu0 %v1729_v15  ;;  %579 = vmatpush.bf16.msra.mxu2 %v1712_v0 }
  0x4a   :  { %587 = vmatpush.bf16.msra.mxu3 %v1675_v33 }
  0x4b   :  { %566 = vmatpush.bf16.msra.mxu1 %v1690_v45 }
  0x4d   :  { %463 = vmatpush.bf16.msra.mxu0 %v1737_v19  ;;  %580 = vmatpush.bf16.msra.mxu2 %v1724_v10 }
  0x4e   :  { %588 = vmatpush.bf16.msra.mxu3 %v1686_v42 }
  0x4f   :  { %567 = vmatpush.bf16.msra.mxu1 %v1700_v54 }
  0x51   :  { %464 = vmatpush.bf16.msra.mxu0 %v1743_v22  ;;  %581 = vmatpush.bf16.msra.mxu2 %v1732_v18 }
  0x52   :  { %589 = vmatpush.bf16.msra.mxu3 %v1696_v51 }
  0x53   :  { %568 = vmatpush.bf16.msra.mxu1 %v1710_v63 }
  0x55   :  { %691 = vmatpush.bf16.msrb.mxu0 %v1647_v4 }
  0x56   :  { %590 = vmatpush.bf16.msra.mxu3 %v1706_v60 }
  0x57   :  { %704 = vmatpush.bf16.msrb.mxu1 %v1658_v14 }
  0x59   :  { %692 = vmatpush.bf16.msrb.mxu0 %v1653_v7 }
  0x5a   :  { %591 = vmatpush.bf16.msra.mxu3 %v1718_v5 }
  0x5b   :  { %705 = vmatpush.bf16.msrb.mxu1 %v1670_v26 }
  0x5d   :  { %693 = vmatpush.bf16.msrb.mxu0 %v1656_v13 }
  0x5e   :  { %592 = vmatpush.bf16.msra.mxu3 %v1729_v15 }
  0x5f   :  { %706 = vmatpush.bf16.msrb.mxu1 %v1681_v37 }
  0x61   :  { %694 = vmatpush.bf16.msrb.mxu0 %v1668_v25 }
  0x62   :  { %593 = vmatpush.bf16.msra.mxu3 %v1737_v19 }
  0x63   :  { %707 = vmatpush.bf16.msrb.mxu1 %v1692_v46 }
  0x65   :  { %695 = vmatpush.bf16.msrb.mxu0 %v1679_v36 }
  0x66   :  { %594 = vmatpush.bf16.msra.mxu3 %v1743_v22 }
  0x67   :  { %708 = vmatpush.bf16.msrb.mxu1 %v1702_v55 }
  0x69   :  { %696 = vmatpush.bf16.msrb.mxu0 %v1690_v45 }
  0x6b   :  { %709 = vmatpush.bf16.msrb.mxu1 %v1712_v0 }
  0x6d   :  { %697 = vmatpush.bf16.msrb.mxu0 %v1700_v54 }
  0x6f   :  { %710 = vmatpush.bf16.msrb.mxu1 %v1724_v10 }
  0x71   :  { %698 = vmatpush.bf16.msrb.mxu0 %v1710_v63 }
  0x73   :  { %711 = vmatpush.bf16.msrb.mxu1 %v1732_v18 }
  0x91   :  { %v92_v30 = vpop.f32.mrf.mxu0 }
  0x92   :  { %v93_v32 = vadd.f32 %v92_v30, %v47_v28 }
  0x93   :  { %v106_v34 = vpop.f32.mrf.mxu1 }
  0x94   :  { %125 = vst [vmem:[#allocation2] sm:$0xff] %v93_v32  ;;  %v107_v38 = vadd.f32 %v106_v34, %v48_v31  ;;  %v52_v32 = vperm.slane %v39_v23, 5 }
  0x96   :  { %126 = vst [vmem:[#allocation2 + $0x8] sm:$0xff] %v107_v38 }
  0x97   :  { %v120_v39 = vpop.f32.mrf.mxu2 }
  0x98   :  { %v121_v40 = vadd.f32 %v120_v39, %v49_v35 }
  0x99   :  { %v94_v41 = vpop.f32.mrf.mxu0 }
  0x9a   :  { %127 = vst [vmem:[#allocation2 + $0x10] sm:$0xff] %v121_v40  ;;  %v95_v43 = vadd.f32 %v94_v41, %v47_v28 }
  0x9b   :  { %v108_v44 = vpop.f32.mrf.mxu1 }
  0x9c   :  { %128 = vst [vmem:[#allocation2 + $0x18] sm:$0xff] %v95_v43  ;;  %v109_v47 = vadd.f32 %v108_v44, %v48_v31 }
  0x9e   :  { %129 = vst [vmem:[#allocation2 + $0x20] sm:$0xff] %v109_v47 }
  0x9f   :  { %v122_v48 = vpop.f32.mrf.mxu2 }
  0xa0   :  { %v123_v49 = vadd.f32 %v122_v48, %v49_v35  ;;  %v1810_v35 = vperm.slane %v52_v32, 1 }
  0xa1   :  { %v164_v2 = vld [vmem:[#allocation2] ss:$8 sm:$0x7] }
  0xa2   :  { %130 = vst [vmem:[#allocation2 + $0x28] sm:$0xff] %v123_v49 }
  0xa9   :  { %v166_v16 = vld [vmem:[#allocation2 + $0x18] ss:$8 sm:$0x7] }
  0xae   :  { %v305_v57 = vpop.f32.mrf.mxu3 }
  0xaf   :  { %v306_v59 = vadd.f32 %v305_v57, %v1802_v53 }
  0xb1   :  { %v318_v58 = vpop.f32.mrf.mxu0 }
  0xb2   :  { %v319_v61 = vadd.f32 %v318_v58, %v1804_v56 }
  0xb3   :  { %v331_v12 = vpop.f32.mrf.mxu1 }
  0xb4   :  { %v337_v62 = vrot.slane %v319_v61, 7  ;;  %v332_v43 = vadd.f32 %v331_v12, %v1810_v35 }
  0xb6   :  { %v339_v3 = vsel %vm338_vm2, %v306_v59, %v337_v62  ;;  %v341_v6 = vsel %vm340_vm3, %v306_v59, %v337_v62  ;;  %v307_v11 = vpop.f32.mrf.mxu3  ;;  %v386_v59 = vrot.slane %v332_v43, 1 }
  0xb7   :  { %v342_v8 = vrot.slane %v341_v6, 1  ;;  %v345_v9 = vadd.f32 %v339_v3, %v164_v2  ;;  %v392_v11 = vrot.slane %v164_v2, 2 }
  0xb9   :  { %v346_v17 = vadd.f32 %v342_v8, %v166_v16  ;;  %v1448_v20 = vmul.f32 -1.442695, %v345_v9  ;;  %v320_v21 = vpop.f32.mrf.mxu0 }
  0xbb   :  { %1493 = vpow2.f32 %v1448_v20  ;;  %v1449_v24 = vmul.f32 -1.442695, %v346_v17  ;;  %v333_v27 = vpop.f32.mrf.mxu1  ;;  %v393_v20 = vrot.slane %v166_v16, 2 }
  0xbd   :  { %1495 = vpow2.f32 %v1449_v24 }
  0xc1   :  { %v1494_v28 = vpop.eup %1493 }
  0xc2   :  { %v353_v29 = vadd.f32 1.0, %v1494_v28 }
  0xc3   :  { %v1496_v30 = vpop.eup %1495 }
  0xc4   :  { %v354_v31 = vadd.f32 1.0, %v1496_v30  ;;  %1497 = vrcp.f32 %v353_v29  ;;  %v366_v44 = vand.u32 2147483648, %v353_v29  ;;  %v364_v48 = vand.u32 2147483647, %v353_v29 }
  0xc5   :  { %vm360_vm5 = vweird.f32 %v353_v29  ;;  %v411_v30 = vrot.slane %v1714_v1, 1 }
  0xc6   :  { %1499 = vrcp.f32 %v354_v31  ;;  %v381_v50 = vand.u32 2147483648, %v354_v31  ;;  %v379_v23 = vand.u32 2147483647, %v354_v31  ;;  %v367_v58 = vor.u32 1.1754944e-38, %v366_v44 }
  0xc7   :  { %vm365_vm8 = vcmp.eq.f32.partialorder %v364_v48, 8.507059e+37  ;;  %vm375_vm9 = vweird.f32 %v354_v31 }
  0xc8   :  { %v382_v6 = vor.u32 1.1754944e-38, %v381_v50  ;;  %vm380_vm11 = vcmp.eq.f32.partialorder %v379_v23, 8.507059e+37 }
  0xca   :  { %v1498_v34 = vpop.eup %1497 }
  0xcb   :  { %v356_v38 = vmul.f32 %v1498_v34, %v353_v29  ;;  %vm361_vm4 = vweird.f32 %v1498_v34 }
  0xcc   :  { %v1500_v39 = vpop.eup %1499  ;;  %vm362_vm7 = vmor %vm360_vm5, %vm361_vm4 }
  0xcd   :  { %v357_v40 = vsub.f32 1.0, %v356_v38  ;;  %v371_v41 = vmul.f32 %v1500_v39, %v354_v31  ;;  %vm376_vm6 = vweird.f32 %v1500_v39 }
  0xce   :  { %vm377_vm10 = vmor %vm375_vm9, %vm376_vm6 }
  0xcf   :  { %v358_v47 = vmul.f32 %v1498_v34, %v357_v40  ;;  %v372_v49 = vsub.f32 1.0, %v371_v41 }
  0xd1   :  { %v359_v52 = vadd.f32 %v1498_v34, %v358_v47  ;;  %v373_v57 = vmul.f32 %v1500_v39, %v372_v49 }
  0xd3   :  { %v363_v61 = vsel %vm362_vm7, %v1498_v34, %v359_v52  ;;  %v374_v62 = vadd.f32 %v1500_v39, %v373_v57 }
  0xd4   :  { %v368_v3 = vsel %vm365_vm8, %v367_v58, %v363_v61 }
  0xd5   :  { %v378_v8 = vsel %vm377_vm10, %v1500_v39, %v374_v62  ;;  %v388_v9 = vmul.f32 %v368_v3, %v332_v43  ;;  %v402_v27 = vrot.slane %v368_v3, 1  ;;  %v418_v3 = vld [vmem:[#allocation2 + $0x1] ss:$8 sm:$0x7] }
  0xd6   :  { %v383_v12 = vsel %vm380_vm11, %v382_v6, %v378_v8 }
  0xd7   :  { %v389_v17 = vmul.f32 %v386_v59, %v383_v12  ;;  %v396_v21 = vadd.f32 %v392_v11, %v388_v9  ;;  %v403_v28 = vrot.slane %v383_v12, 1  ;;  %v406_v29 = vsub.f32 1.0, %v402_v27  ;;  %v420_v12 = vld [vmem:[#allocation2 + $0x19] ss:$8 sm:$0x7] }
  0xd8   :  { %v413_v38 = vmul.f32 %v402_v27, %v1714_v1 }
  0xd9   :  { %v397_v24 = vadd.f32 %v393_v20, %v389_v17  ;;  %1501 = vtanh.f32 %v396_v21  ;;  %v407_v32 = vsub.f32 1.0, %v403_v28  ;;  %v414_v2 = vmul.f32 %v411_v30, %v403_v28 }
  0xdb   :  { %1503 = vtanh.f32 %v397_v24 }
  0xdf   :  { %v1502_v31 = vpop.eup %1501 }
  0xe0   :  { %v408_v34 = vmul.f32 %v1502_v31, %v406_v29 }
  0xe1   :  { %v1504_v39 = vpop.eup %1503 }
  0xe2   :  { %v409_v40 = vmul.f32 %v1504_v39, %v407_v32  ;;  %v1815_v41 = vadd.f32 %v413_v38, %v408_v34 }
  0xe4   :  { %v1817_v16 = vadd.f32 %v414_v2, %v409_v40  ;;  %v421_v43 = vpack.c.bf16 %v1815_v41, %v1815_v41 }
  0xe6   :  { %v422_v44 = vpack.c.bf16 %v1817_v16, %v1817_v16  ;;  %v425_v48 = vunpack.c.l.b16 %v421_v43 }
  0xe8   :  { %v426_v47 = vunpack.c.l.b16 %v422_v44 }
  0xea   :  { %v427_v49 = vrot.slane %v426_v47, 7 }
  0xec   :  { %v428_v50 = vsel %vm340_vm3, %v427_v49, %v425_v48 }
  0xed   :  { %v429_v52 = vpack.c.b16 %v428_v50, %v428_v50 }
  0xef   :  { %439 = vmatmul.bf16.vlgmr.msrb.gmra.mxu2 %v429_v52  ;;  %452 = vmatmul.bf16.vlgmr.msrb.gmra.mxu3 %v429_v52 }
  0xf0   :  { %465 = vmatmul.bf16.vlgmr.msra.gmra.mxu0 %v429_v52  ;;  %717 = vmatpush.bf16.msrb.mxu2 %v1675_v33 }
  0xf1   :  { %821 = vmatpush.bf16.msrb.mxu3 %v1647_v4  ;;  %834 = vmatpush.bf16.msra.mxu0 %v1658_v14 }
  0xf4   :  { %718 = vmatpush.bf16.msrb.mxu2 %v1686_v42 }
  0xf5   :  { %822 = vmatpush.bf16.msrb.mxu3 %v1653_v7  ;;  %835 = vmatpush.bf16.msra.mxu0 %v1670_v26 }
  0xf8   :  { %719 = vmatpush.bf16.msrb.mxu2 %v1696_v51 }
  0xf9   :  { %823 = vmatpush.bf16.msrb.mxu3 %v1656_v13  ;;  %836 = vmatpush.bf16.msra.mxu0 %v1681_v37 }
  0xfc   :  { %720 = vmatpush.bf16.msrb.mxu2 %v1706_v60 }
  0xfd   :  { %824 = vmatpush.bf16.msrb.mxu3 %v1668_v25  ;;  %837 = vmatpush.bf16.msra.mxu0 %v1692_v46 }
 0x100   :  { %721 = vmatpush.bf16.msrb.mxu2 %v1718_v5 }
 0x101   :  { %825 = vmatpush.bf16.msrb.mxu3 %v1679_v36  ;;  %838 = vmatpush.bf16.msra.mxu0 %v1702_v55 }
 0x104   :  { %722 = vmatpush.bf16.msrb.mxu2 %v1729_v15 }
 0x105   :  { %826 = vmatpush.bf16.msrb.mxu3 %v1690_v45  ;;  %839 = vmatpush.bf16.msra.mxu0 %v1712_v0 }
 0x108   :  { %723 = vmatpush.bf16.msrb.mxu2 %v1737_v19 }
 0x109   :  { %827 = vmatpush.bf16.msrb.mxu3 %v1700_v54  ;;  %840 = vmatpush.bf16.msra.mxu0 %v1724_v10 }
 0x10c   :  { %724 = vmatpush.bf16.msrb.mxu2 %v1743_v22 }
 0x10d   :  { %828 = vmatpush.bf16.msrb.mxu3 %v1710_v63  ;;  %841 = vmatpush.bf16.msra.mxu0 %v1732_v18 }
 0x16d   :  { %v466_v1 = vpop.f32.mrf.mxu0 }
 0x16e   :  { %v467_v48 = vadd.f32 %v466_v1, %v1810_v35 }
 0x172   :  { %v440_v57 = vpop.f32.mrf.mxu2  ;;  %v453_v23 = vpop.f32.mrf.mxu3 }
 0x173   :  { %v454_v58 = vadd.f32 %v453_v23, %v1804_v56  ;;  %v441_v59 = vadd.f32 %v440_v57, %v1802_v53 }
 0x175   :  { %v472_v61 = vrot.slane %v454_v58, 7  ;;  %v468_v62 = vpop.f32.mrf.mxu0 }
 0x177   :  { %v473_v6 = vsel %vm338_vm2, %v441_v59, %v472_v61  ;;  %v474_v8 = vsel %vm340_vm3, %v441_v59, %v472_v61 }
 0x178   :  { %v475_v9 = vrot.slane %v474_v8, 1  ;;  %v478_v11 = vadd.f32 %v473_v6, %v418_v3  ;;  %v525_v6 = vrot.slane %v418_v3, 2  ;;  %v519_v8 = vrot.slane %v467_v48, 1 }
 0x17a   :  { %v479_v17 = vadd.f32 %v475_v9, %v420_v12  ;;  %v1450_v20 = vmul.f32 -1.442695, %v478_v11  ;;  %v442_v21 = vpop.f32.mrf.mxu2  ;;  %v455_v24 = vpop.f32.mrf.mxu3 }
 0x17c   :  { %1505 = vpow2.f32 %v1450_v20  ;;  %v1451_v27 = vmul.f32 -1.442695, %v479_v17  ;;  %v526_v20 = vrot.slane %v420_v12, 2 }
 0x17e   :  { %1507 = vpow2.f32 %v1451_v27 }
 0x182   :  { %v1506_v28 = vpop.eup %1505 }
 0x183   :  { %v486_v29 = vadd.f32 1.0, %v1506_v28 }
 0x184   :  { %v1508_v30 = vpop.eup %1507 }
 0x185   :  { %v487_v31 = vadd.f32 1.0, %v1508_v30  ;;  %1509 = vrcp.f32 %v486_v29  ;;  %v499_v2 = vand.u32 2147483648, %v486_v29  ;;  %v497_v44 = vand.u32 2147483647, %v486_v29 }
 0x186   :  { %vm493_vm13 = vweird.f32 %v486_v29 }
 0x187   :  { %1511 = vrcp.f32 %v487_v31  ;;  %v514_v49 = vand.u32 2147483648, %v487_v31  ;;  %v512_v57 = vand.u32 2147483647, %v487_v31  ;;  %v500_v23 = vor.u32 1.1754944e-38, %v499_v2 }
 0x188   :  { %vm498_vm0 = vcmp.eq.f32.partialorder %v497_v44, 8.507059e+37  ;;  %vm508_vm1 = vweird.f32 %v487_v31 }
 0x189   :  { %v515_v62 = vor.u32 1.1754944e-38, %v514_v49  ;;  %vm513_vm5 = vcmp.eq.f32.partialorder %v512_v57, 8.507059e+37 }
 0x18b   :  { %v1510_v32 = vpop.eup %1509 }
 0x18c   :  { %v489_v34 = vmul.f32 %v1510_v32, %v486_v29  ;;  %vm494_vm12 = vweird.f32 %v1510_v32 }
 0x18d   :  { %v1512_v38 = vpop.eup %1511  ;;  %vm495_vm15 = vmor %vm493_vm13, %vm494_vm12 }
 0x18e   :  { %v490_v39 = vsub.f32 1.0, %v489_v34  ;;  %v504_v40 = vmul.f32 %v1512_v38, %v487_v31  ;;  %vm509_vm14 = vweird.f32 %v1512_v38 }
 0x18f   :  { %vm510_vm4 = vmor %vm508_vm1, %vm509_vm14 }
 0x190   :  { %v491_v43 = vmul.f32 %v1510_v32, %v490_v39  ;;  %v505_v47 = vsub.f32 1.0, %v504_v40 }
 0x192   :  { %v492_v50 = vadd.f32 %v1510_v32, %v491_v43  ;;  %v506_v52 = vmul.f32 %v1512_v38, %v505_v47 }
 0x194   :  { %v496_v58 = vsel %vm495_vm15, %v1510_v32, %v492_v50  ;;  %v507_v59 = vadd.f32 %v1512_v38, %v506_v52 }
 0x195   :  { %v501_v61 = vsel %vm498_vm0, %v500_v23, %v496_v58 }
 0x196   :  { %v511_v9 = vsel %vm510_vm4, %v1512_v38, %v507_v59  ;;  %v521_v1 = vmul.f32 %v501_v61, %v467_v48  ;;  %v535_v27 = vrot.slane %v501_v61, 1  ;;  %v548_v61 = vld [vmem:[#allocation2 + $0x2] ss:$8 sm:$0x7] }
 0x197   :  { %v516_v11 = vsel %vm513_vm5, %v515_v62, %v511_v9 }
 0x198   :  { %v522_v17 = vmul.f32 %v519_v8, %v516_v11  ;;  %v529_v21 = vadd.f32 %v525_v6, %v521_v1  ;;  %v536_v28 = vrot.slane %v516_v11, 1  ;;  %v539_v29 = vsub.f32 1.0, %v535_v27  ;;  %v550_v1 = vld [vmem:[#allocation2 + $0x1a] ss:$8 sm:$0x7] }
 0x199   :  { %v543_v32 = vmul.f32 %v535_v27, %v1815_v41 }
 0x19a   :  { %v530_v24 = vadd.f32 %v526_v20, %v522_v17  ;;  %1513 = vtanh.f32 %v529_v21  ;;  %v540_v31 = vsub.f32 1.0, %v536_v28  ;;  %v544_v38 = vmul.f32 %v536_v28, %v1817_v16 }
 0x19c   :  { %1515 = vtanh.f32 %v530_v24 }
 0x1a0   :  { %v1514_v30 = vpop.eup %1513 }
 0x1a1   :  { %v541_v34 = vmul.f32 %v1514_v30, %v539_v29 }
 0x1a2   :  { %v1516_v3 = vpop.eup %1515 }
 0x1a3   :  { %v542_v39 = vmul.f32 %v1516_v3, %v540_v31  ;;  %v1855_v40 = vadd.f32 %v543_v32, %v541_v34 }
 0x1a5   :  { %v1857_v2 = vadd.f32 %v544_v38, %v542_v39  ;;  %v551_v12 = vpack.c.bf16 %v1855_v40, %v1855_v40 }
 0x1a7   :  { %v552_v43 = vpack.c.bf16 %v1857_v2, %v1857_v2  ;;  %v555_v47 = vunpack.c.l.b16 %v551_v12 }
 0x1a9   :  { %v556_v44 = vunpack.c.l.b16 %v552_v43 }
 0x1ab   :  { %v557_v48 = vrot.slane %v556_v44, 7 }
 0x1ad   :  { %v558_v41 = vsel %vm340_vm3, %v557_v48, %v555_v47 }
 0x1ae   :  { %v559_v49 = vpack.c.b16 %v558_v41, %v558_v41 }
 0x1b0   :  { %569 = vmatmul.bf16.vlgmr.msra.gmra.mxu1 %v559_v49  ;;  %582 = vmatmul.bf16.vlgmr.msra.gmra.mxu2 %v559_v49 }
 0x1b1   :  { %595 = vmatmul.bf16.vlgmr.msra.gmra.mxu3 %v559_v49  ;;  %847 = vmatpush.bf16.msra.mxu1 %v1675_v33 }
 0x1b2   :  { %951 = vmatpush.bf16.msra.mxu2 %v1647_v4  ;;  %964 = vmatpush.bf16.msra.mxu3 %v1658_v14 }
 0x1b5   :  { %848 = vmatpush.bf16.msra.mxu1 %v1686_v42 }
 0x1b6   :  { %952 = vmatpush.bf16.msra.mxu2 %v1653_v7  ;;  %965 = vmatpush.bf16.msra.mxu3 %v1670_v26 }
 0x1b9   :  { %849 = vmatpush.bf16.msra.mxu1 %v1696_v51 }
 0x1ba   :  { %953 = vmatpush.bf16.msra.mxu2 %v1656_v13  ;;  %966 = vmatpush.bf16.msra.mxu3 %v1681_v37 }
 0x1bd   :  { %850 = vmatpush.bf16.msra.mxu1 %v1706_v60 }
 0x1be   :  { %954 = vmatpush.bf16.msra.mxu2 %v1668_v25  ;;  %967 = vmatpush.bf16.msra.mxu3 %v1692_v46 }
 0x1c1   :  { %851 = vmatpush.bf16.msra.mxu1 %v1718_v5 }
 0x1c2   :  { %955 = vmatpush.bf16.msra.mxu2 %v1679_v36  ;;  %968 = vmatpush.bf16.msra.mxu3 %v1702_v55 }
 0x1c5   :  { %852 = vmatpush.bf16.msra.mxu1 %v1729_v15 }
 0x1c6   :  { %956 = vmatpush.bf16.msra.mxu2 %v1690_v45  ;;  %969 = vmatpush.bf16.msra.mxu3 %v1712_v0 }
 0x1c9   :  { %853 = vmatpush.bf16.msra.mxu1 %v1737_v19 }
 0x1ca   :  { %957 = vmatpush.bf16.msra.mxu2 %v1700_v54  ;;  %970 = vmatpush.bf16.msra.mxu3 %v1724_v10 }
 0x1cd   :  { %854 = vmatpush.bf16.msra.mxu1 %v1743_v22 }
 0x1ce   :  { %958 = vmatpush.bf16.msra.mxu2 %v1710_v63  ;;  %971 = vmatpush.bf16.msra.mxu3 %v1732_v18 }
 0x22d   :  { %v570_v16 = vpop.f32.mrf.mxu1 }
 0x22e   :  { %v571_v58 = vadd.f32 %v570_v16, %v1802_v53 }
 0x233   :  { %v583_v50 = vpop.f32.mrf.mxu2 }
 0x234   :  { %v584_v52 = vadd.f32 %v583_v50, %v1804_v56  ;;  %v596_v57 = vpop.f32.mrf.mxu3 }
 0x235   :  { %v572_v23 = vpop.f32.mrf.mxu1  ;;  %v597_v47 = vadd.f32 %v596_v57, %v1810_v35 }
 0x236   :  { %v602_v59 = vrot.slane %v584_v52, 7 }
 0x238   :  { %v603_v62 = vsel %vm338_vm2, %v571_v58, %v602_v59  ;;  %v604_v6 = vsel %vm340_vm3, %v571_v58, %v602_v59 }
 0x239   :  { %v605_v8 = vrot.slane %v604_v6, 1  ;;  %v608_v9 = vadd.f32 %v603_v62, %v548_v61  ;;  %v655_v62 = vrot.slane %v548_v61, 2 }
 0x23b   :  { %v609_v11 = vadd.f32 %v605_v8, %v550_v1  ;;  %v1452_v17 = vmul.f32 -1.442695, %v608_v9  ;;  %v585_v20 = vpop.f32.mrf.mxu2  ;;  %v649_v8 = vrot.slane %v597_v47, 1 }
 0x23c   :  { %v598_v21 = vpop.f32.mrf.mxu3 }
 0x23d   :  { %1517 = vpow2.f32 %v1452_v17  ;;  %v1453_v24 = vmul.f32 -1.442695, %v609_v11  ;;  %v656_v17 = vrot.slane %v550_v1, 2 }
 0x23f   :  { %1519 = vpow2.f32 %v1453_v24 }
 0x243   :  { %v1518_v27 = vpop.eup %1517 }
 0x244   :  { %v616_v28 = vadd.f32 1.0, %v1518_v27 }
 0x245   :  { %v1520_v29 = vpop.eup %1519 }
 0x246   :  { %v617_v30 = vadd.f32 1.0, %v1520_v29  ;;  %1521 = vrcp.f32 %v616_v28  ;;  %v629_v38 = vand.u32 2147483648, %v616_v28  ;;  %v627_v43 = vand.u32 2147483647, %v616_v28 }
 0x247   :  { %vm623_vm7 = vweird.f32 %v616_v28 }
 0x248   :  { %1523 = vrcp.f32 %v617_v30  ;;  %v644_v48 = vand.u32 2147483648, %v617_v30  ;;  %v642_v16 = vand.u32 2147483647, %v617_v30  ;;  %v630_v50 = vor.u32 1.1754944e-38, %v629_v38 }
 0x249   :  { %vm628_vm10 = vcmp.eq.f32.partialorder %v627_v43, 8.507059e+37  ;;  %vm638_vm11 = vweird.f32 %v617_v30 }
 0x24a   :  { %v645_v59 = vor.u32 1.1754944e-38, %v644_v48  ;;  %vm643_vm13 = vcmp.eq.f32.partialorder %v642_v16, 8.507059e+37 }
 0x24c   :  { %v1522_v31 = vpop.eup %1521 }
 0x24d   :  { %v619_v32 = vmul.f32 %v1522_v31, %v616_v28  ;;  %vm624_vm6 = vweird.f32 %v1522_v31 }
 0x24e   :  { %v1524_v34 = vpop.eup %1523  ;;  %vm625_vm9 = vmor %vm623_vm7, %vm624_vm6 }
 0x24f   :  { %v620_v3 = vsub.f32 1.0, %v619_v32  ;;  %v634_v39 = vmul.f32 %v1524_v34, %v617_v30  ;;  %vm639_vm8 = vweird.f32 %v1524_v34 }
 0x250   :  { %vm640_vm12 = vmor %vm638_vm11, %vm639_vm8 }
 0x251   :  { %v621_v12 = vmul.f32 %v1522_v31, %v620_v3  ;;  %v635_v44 = vsub.f32 1.0, %v634_v39 }
 0x253   :  { %v622_v41 = vadd.f32 %v1522_v31, %v621_v12  ;;  %v636_v49 = vmul.f32 %v1524_v34, %v635_v44 }
 0x255   :  { %v626_v52 = vsel %vm625_vm9, %v1522_v31, %v622_v41  ;;  %v637_v23 = vadd.f32 %v1524_v34, %v636_v49 }
 0x256   :  { %v631_v58 = vsel %vm628_vm10, %v630_v50, %v626_v52  ;;  %v678_v52 = vld [vmem:[#allocation2 + $0x3] ss:$8 sm:$0x7] }
 0x257   :  { %v641_v6 = vsel %vm640_vm12, %v1524_v34, %v637_v23  ;;  %v651_v57 = vmul.f32 %v631_v58, %v597_v47  ;;  %v665_v24 = vrot.slane %v631_v58, 1 }
 0x258   :  { %v646_v9 = vsel %vm643_vm13, %v645_v59, %v641_v6  ;;  %v680_v6 = vld [vmem:[#allocation2 + $0x1b] ss:$8 sm:$0x7] }
 0x259   :  { %v652_v11 = vmul.f32 %v649_v8, %v646_v9  ;;  %v659_v20 = vadd.f32 %v655_v62, %v651_v57  ;;  %v666_v27 = vrot.slane %v646_v9, 1  ;;  %v669_v28 = vsub.f32 1.0, %v665_v24 }
 0x25a   :  { %v673_v32 = vmul.f32 %v665_v24, %v1855_v40 }
 0x25b   :  { %v660_v21 = vadd.f32 %v656_v17, %v652_v11  ;;  %1525 = vtanh.f32 %v659_v20  ;;  %v670_v30 = vsub.f32 1.0, %v666_v27  ;;  %v674_v3 = vmul.f32 %v666_v27, %v1857_v2 }
 0x25d   :  { %1527 = vtanh.f32 %v660_v21 }
 0x261   :  { %v1526_v29 = vpop.eup %1525 }
 0x262   :  { %v671_v31 = vmul.f32 %v1526_v29, %v669_v28 }
 0x263   :  { %v1528_v61 = vpop.eup %1527 }
 0x264   :  { %v672_v34 = vmul.f32 %v1528_v61, %v670_v30  ;;  %v1895_v39 = vadd.f32 %v673_v32, %v671_v31 }
 0x266   :  { %v1897_v38 = vadd.f32 %v674_v3, %v672_v34  ;;  %v681_v1 = vpack.c.bf16 %v1895_v39, %v1895_v39 }
 0x268   :  { %v682_v12 = vpack.c.bf16 %v1897_v38, %v1897_v38  ;;  %v685_v44 = vunpack.c.l.b16 %v681_v1 }
 0x26a   :  { %v686_v43 = vunpack.c.l.b16 %v682_v12 }
 0x26c   :  { %v687_v47 = vrot.slane %v686_v43, 7 }
 0x26e   :  { %v688_v48 = vsel %vm340_vm3, %v687_v47, %v685_v44 }
 0x26f   :  { %v689_v40 = vpack.c.b16 %v688_v48, %v688_v48 }
 0x271   :  { %699 = vmatmul.bf16.vlgmr.msrb.gmra.mxu0 %v689_v40  ;;  %712 = vmatmul.bf16.vlgmr.msrb.gmra.mxu1 %v689_v40 }
 0x272   :  { %725 = vmatmul.bf16.vlgmr.msrb.gmra.mxu2 %v689_v40  ;;  %977 = vmatpush.bf16.msrb.mxu0 %v1675_v33 }
 0x273   :  { %1081 = vmatpush.bf16.msrb.mxu1 %v1647_v4  ;;  %1094 = vmatpush.bf16.msrb.mxu2 %v1658_v14 }
 0x276   :  { %978 = vmatpush.bf16.msrb.mxu0 %v1686_v42 }
 0x277   :  { %1082 = vmatpush.bf16.msrb.mxu1 %v1653_v7  ;;  %1095 = vmatpush.bf16.msrb.mxu2 %v1670_v26 }
 0x27a   :  { %979 = vmatpush.bf16.msrb.mxu0 %v1696_v51 }
 0x27b   :  { %1083 = vmatpush.bf16.msrb.mxu1 %v1656_v13  ;;  %1096 = vmatpush.bf16.msrb.mxu2 %v1681_v37 }
 0x27e   :  { %980 = vmatpush.bf16.msrb.mxu0 %v1706_v60 }
 0x27f   :  { %1084 = vmatpush.bf16.msrb.mxu1 %v1668_v25  ;;  %1097 = vmatpush.bf16.msrb.mxu2 %v1692_v46 }
 0x282   :  { %981 = vmatpush.bf16.msrb.mxu0 %v1718_v5 }
 0x283   :  { %1085 = vmatpush.bf16.msrb.mxu1 %v1679_v36  ;;  %1098 = vmatpush.bf16.msrb.mxu2 %v1702_v55 }
 0x286   :  { %982 = vmatpush.bf16.msrb.mxu0 %v1729_v15 }
 0x287   :  { %1086 = vmatpush.bf16.msrb.mxu1 %v1690_v45  ;;  %1099 = vmatpush.bf16.msrb.mxu2 %v1712_v0 }
 0x28a   :  { %983 = vmatpush.bf16.msrb.mxu0 %v1737_v19 }
 0x28b   :  { %1087 = vmatpush.bf16.msrb.mxu1 %v1700_v54  ;;  %1100 = vmatpush.bf16.msrb.mxu2 %v1724_v10 }
 0x28e   :  { %984 = vmatpush.bf16.msrb.mxu0 %v1743_v22 }
 0x28f   :  { %1088 = vmatpush.bf16.msrb.mxu1 %v1710_v63  ;;  %1101 = vmatpush.bf16.msrb.mxu2 %v1732_v18 }
 0x2ee   :  { %v700_v2 = vpop.f32.mrf.mxu0  ;;  %v713_v41 = vpop.f32.mrf.mxu1 }
 0x2ef   :  { %v714_v49 = vadd.f32 %v713_v41, %v1804_v56  ;;  %v701_v16 = vadd.f32 %v700_v2, %v1802_v53 }
 0x2f1   :  { %v732_v50 = vrot.slane %v714_v49, 7 }
 0x2f3   :  { %v733_v23 = vsel %vm338_vm2, %v701_v16, %v732_v50  ;;  %v734_v58 = vsel %vm340_vm3, %v701_v16, %v732_v50 }
 0x2f4   :  { %v735_v59 = vrot.slane %v734_v58, 1  ;;  %v738_v62 = vadd.f32 %v733_v23, %v678_v52  ;;  %v785_v58 = vrot.slane %v678_v52, 2 }
 0x2f5   :  { %v726_v8 = vpop.f32.mrf.mxu2 }
 0x2f6   :  { %v739_v57 = vadd.f32 %v735_v59, %v680_v6  ;;  %v1454_v9 = vmul.f32 -1.442695, %v738_v62  ;;  %v702_v11 = vpop.f32.mrf.mxu0  ;;  %v715_v17 = vpop.f32.mrf.mxu1  ;;  %v727_v44 = vadd.f32 %v726_v8, %v1810_v35 }
 0x2f7   :  { %v786_v11 = vrot.slane %v680_v6, 2 }
 0x2f8   :  { %1529 = vpow2.f32 %v1454_v9  ;;  %v1455_v20 = vmul.f32 -1.442695, %v739_v57  ;;  %v779_v62 = vrot.slane %v727_v44, 1 }
 0x2fa   :  { %1531 = vpow2.f32 %v1455_v20 }
 0x2fd   :  { %v728_v21 = vpop.f32.mrf.mxu2 }
 0x2fe   :  { %v1530_v24 = vpop.eup %1529 }
 0x2ff   :  { %v746_v27 = vadd.f32 1.0, %v1530_v24 }
 0x300   :  { %v1532_v28 = vpop.eup %1531 }
 0x301   :  { %v747_v29 = vadd.f32 1.0, %v1532_v28  ;;  %1533 = vrcp.f32 %v746_v27  ;;  %v759_v3 = vand.u32 2147483648, %v746_v27  ;;  %v757_v12 = vand.u32 2147483647, %v746_v27 }
 0x302   :  { %vm753_vm15 = vweird.f32 %v746_v27 }
 0x303   :  { %1535 = vrcp.f32 %v747_v29  ;;  %v774_v47 = vand.u32 2147483648, %v747_v29  ;;  %v772_v2 = vand.u32 2147483647, %v747_v29  ;;  %v760_v41 = vor.u32 1.1754944e-38, %v759_v3 }
 0x304   :  { %vm758_vm4 = vcmp.eq.f32.partialorder %v757_v12, 8.507059e+37  ;;  %vm768_vm5 = vweird.f32 %v747_v29 }
 0x305   :  { %v775_v23 = vor.u32 1.1754944e-38, %v774_v47  ;;  %vm773_vm7 = vcmp.eq.f32.partialorder %v772_v2, 8.507059e+37 }
 0x307   :  { %v1534_v30 = vpop.eup %1533 }
 0x308   :  { %v749_v31 = vmul.f32 %v1534_v30, %v746_v27  ;;  %vm754_vm14 = vweird.f32 %v1534_v30 }
 0x309   :  { %v1536_v32 = vpop.eup %1535  ;;  %vm755_vm1 = vmor %vm753_vm15, %vm754_vm14 }
 0x30a   :  { %v750_v61 = vsub.f32 1.0, %v749_v31  ;;  %v764_v34 = vmul.f32 %v1536_v32, %v747_v29  ;;  %vm769_vm0 = vweird.f32 %v1536_v32 }
 0x30b   :  { %vm770_vm6 = vmor %vm768_vm5, %vm769_vm0 }
 0x30c   :  { %v751_v1 = vmul.f32 %v1534_v30, %v750_v61  ;;  %v765_v43 = vsub.f32 1.0, %v764_v34 }
 0x30e   :  { %v752_v48 = vadd.f32 %v1534_v30, %v751_v1  ;;  %v766_v40 = vmul.f32 %v1536_v32, %v765_v43 }
 0x310   :  { %v756_v49 = vsel %vm755_vm1, %v1534_v30, %v752_v48  ;;  %v767_v16 = vadd.f32 %v1536_v32, %v766_v40 }
 0x311   :  { %v761_v50 = vsel %vm758_vm4, %v760_v41, %v756_v49 }
 0x312   :  { %v771_v59 = vsel %vm770_vm6, %v1536_v32, %v767_v16  ;;  %v781_v8 = vmul.f32 %v761_v50, %v727_v44  ;;  %v795_v21 = vrot.slane %v761_v50, 1 }
 0x313   :  { %v776_v57 = vsel %vm773_vm7, %v775_v23, %v771_v59 }
 0x314   :  { %v782_v9 = vmul.f32 %v779_v62, %v776_v57  ;;  %v789_v17 = vadd.f32 %v785_v58, %v781_v8  ;;  %v796_v24 = vrot.slane %v776_v57, 1  ;;  %v799_v27 = vsub.f32 1.0, %v795_v21 }
 0x315   :  { %v803_v31 = vmul.f32 %v795_v21, %v1895_v39 }
 0x316   :  { %v790_v20 = vadd.f32 %v786_v11, %v782_v9  ;;  %1537 = vtanh.f32 %v789_v17  ;;  %v800_v29 = vsub.f32 1.0, %v796_v24  ;;  %v804_v61 = vmul.f32 %v796_v24, %v1897_v38 }
 0x318   :  { %1539 = vtanh.f32 %v790_v20 }
 0x31c   :  { %v1538_v28 = vpop.eup %1537 }
 0x31d   :  { %v801_v30 = vmul.f32 %v1538_v28, %v799_v27 }
 0x31e   :  { %v1540_v52 = vpop.eup %1539 }
 0x31f   :  { %v802_v32 = vmul.f32 %v1540_v52, %v800_v29  ;;  %v1935_v34 = vadd.f32 %v803_v31, %v801_v30 }
 0x321   :  { %v1937_v3 = vadd.f32 %v804_v61, %v802_v32  ;;  %v811_v6 = vpack.c.bf16 %v1935_v34, %v1935_v34 }
 0x323   :  { %v812_v1 = vpack.c.bf16 %v1937_v3, %v1937_v3  ;;  %v815_v43 = vunpack.c.l.b16 %v811_v6 }
 0x325   :  { %v816_v12 = vunpack.c.l.b16 %v812_v1 }
 0x327   :  { %v817_v44 = vrot.slane %v816_v12, 7 }
 0x329   :  { %v818_v47 = vsel %vm340_vm3, %v817_v44, %v815_v43 }
 0x32a   :  { %v819_v39 = vpack.c.b16 %v818_v47, %v818_v47 }
 0x32c   :  { %829 = vmatmul.bf16.vlgmr.msrb.gmra.mxu3 %v819_v39  ;;  %842 = vmatmul.bf16.vlgmr.msra.gmra.mxu0 %v819_v39 }
 0x32d   :  { %855 = vmatmul.bf16.vlgmr.msra.gmra.mxu1 %v819_v39  ;;  %1107 = vmatpush.bf16.msrb.mxu3 %v1675_v33 }
 0x32e   :  { %1211 = vmatpush.bf16.msra.mxu0 %v1647_v4  ;;  %1224 = vmatpush.bf16.msra.mxu1 %v1658_v14 }
 0x331   :  { %1108 = vmatpush.bf16.msrb.mxu3 %v1686_v42 }
 0x332   :  { %1212 = vmatpush.bf16.msra.mxu0 %v1653_v7  ;;  %1225 = vmatpush.bf16.msra.mxu1 %v1670_v26 }
 0x335   :  { %1109 = vmatpush.bf16.msrb.mxu3 %v1696_v51 }
 0x336   :  { %1213 = vmatpush.bf16.msra.mxu0 %v1656_v13  ;;  %1226 = vmatpush.bf16.msra.mxu1 %v1681_v37  ;;  %v808_v37 = vld [vmem:[#allocation2 + $0x4] ss:$8 sm:$0x7] }
 0x337   :  { %v915_v52 = vrot.slane %v808_v37, 2 }
 0x339   :  { %1110 = vmatpush.bf16.msrb.mxu3 %v1706_v60 }
 0x33a   :  { %1214 = vmatpush.bf16.msra.mxu0 %v1668_v25  ;;  %1227 = vmatpush.bf16.msra.mxu1 %v1692_v46 }
 0x33d   :  { %1111 = vmatpush.bf16.msrb.mxu3 %v1718_v5 }
 0x33e   :  { %1215 = vmatpush.bf16.msra.mxu0 %v1679_v36  ;;  %1228 = vmatpush.bf16.msra.mxu1 %v1702_v55 }
 0x341   :  { %1112 = vmatpush.bf16.msrb.mxu3 %v1729_v15 }
 0x342   :  { %1216 = vmatpush.bf16.msra.mxu0 %v1690_v45  ;;  %1229 = vmatpush.bf16.msra.mxu1 %v1712_v0 }
 0x345   :  { %1113 = vmatpush.bf16.msrb.mxu3 %v1737_v19 }
 0x346   :  { %1217 = vmatpush.bf16.msra.mxu0 %v1700_v54  ;;  %1230 = vmatpush.bf16.msra.mxu1 %v1724_v10 }
 0x349   :  { %1114 = vmatpush.bf16.msrb.mxu3 %v1743_v22 }
 0x34a   :  { %1218 = vmatpush.bf16.msra.mxu0 %v1710_v63  ;;  %1231 = vmatpush.bf16.msra.mxu1 %v1732_v18  ;;  %v810_v63 = vld [vmem:[#allocation2 + $0x1c] ss:$8 sm:$0x7] }
 0x34b   :  { %v916_v43 = vrot.slane %v810_v63, 2 }
 0x3a9   :  { %v843_v4 = vpop.f32.mrf.mxu0 }
 0x3aa   :  { %v856_v7 = vpop.f32.mrf.mxu1  ;;  %v844_v13 = vadd.f32 %v843_v4, %v1804_v56 }
 0x3ab   :  { %v857_v11 = vadd.f32 %v856_v7, %v1810_v35 }
 0x3ac   :  { %v862_v25 = vrot.slane %v844_v13, 7 }
 0x3ad   :  { %v909_v32 = vrot.slane %v857_v11, 1 }
 0x3af   :  { %v830_v14 = vpop.f32.mrf.mxu3 }
 0x3b0   :  { %v831_v26 = vadd.f32 %v830_v14, %v1802_v53 }
 0x3b1   :  { %v845_v36 = vpop.f32.mrf.mxu0 }
 0x3b2   :  { %v863_v45 = vsel %vm338_vm2, %v831_v26, %v862_v25  ;;  %v864_v46 = vsel %vm340_vm3, %v831_v26, %v862_v25  ;;  %v858_v54 = vpop.f32.mrf.mxu1 }
 0x3b3   :  { %v865_v55 = vrot.slane %v864_v46, 1  ;;  %v868_v0 = vadd.f32 %v863_v45, %v808_v37 }
 0x3b5   :  { %v869_v10 = vadd.f32 %v865_v55, %v810_v63  ;;  %v1456_v18 = vmul.f32 -1.442695, %v868_v0 }
 0x3b7   :  { %1541 = vpow2.f32 %v1456_v18  ;;  %v1457_v38 = vmul.f32 -1.442695, %v869_v10  ;;  %v832_v48 = vpop.f32.mrf.mxu3 }
 0x3b9   :  { %1543 = vpow2.f32 %v1457_v38 }
 0x3bd   :  { %v1542_v40 = vpop.eup %1541 }
 0x3be   :  { %v876_v2 = vadd.f32 1.0, %v1542_v40 }
 0x3bf   :  { %v1544_v41 = vpop.eup %1543 }
 0x3c0   :  { %v877_v49 = vadd.f32 1.0, %v1544_v41  ;;  %1545 = vrcp.f32 %v876_v2  ;;  %v889_v62 = vand.u32 2147483648, %v876_v2  ;;  %v887_v57 = vand.u32 2147483647, %v876_v2 }
 0x3c1   :  { %vm883_vm9 = vweird.f32 %v876_v2 }
 0x3c2   :  { %1547 = vrcp.f32 %v877_v49  ;;  %v904_v17 = vand.u32 2147483648, %v877_v49  ;;  %v902_v24 = vand.u32 2147483647, %v877_v49  ;;  %v890_v27 = vor.u32 1.1754944e-38, %v889_v62 }
 0x3c3   :  { %vm888_vm12 = vcmp.eq.f32.partialorder %v887_v57, 8.507059e+37  ;;  %vm898_vm13 = vweird.f32 %v877_v49 }
 0x3c4   :  { %v905_v31 = vor.u32 1.1754944e-38, %v904_v17  ;;  %vm903_vm15 = vcmp.eq.f32.partialorder %v902_v24, 8.507059e+37 }
 0x3c6   :  { %v1546_v16 = vpop.eup %1545 }
 0x3c7   :  { %v879_v50 = vmul.f32 %v1546_v16, %v876_v2  ;;  %vm884_vm8 = vweird.f32 %v1546_v16 }
 0x3c8   :  { %v1548_v23 = vpop.eup %1547  ;;  %vm885_vm11 = vmor %vm883_vm9, %vm884_vm8 }
 0x3c9   :  { %v880_v58 = vsub.f32 1.0, %v879_v50  ;;  %v894_v59 = vmul.f32 %v1548_v23, %v877_v49  ;;  %vm899_vm10 = vweird.f32 %v1548_v23 }
 0x3ca   :  { %vm900_vm14 = vmor %vm898_vm13, %vm899_vm10 }
 0x3cb   :  { %v881_v8 = vmul.f32 %v1546_v16, %v880_v58  ;;  %v895_v9 = vsub.f32 1.0, %v894_v59 }
 0x3cd   :  { %v882_v20 = vadd.f32 %v1546_v16, %v881_v8  ;;  %v896_v21 = vmul.f32 %v1548_v23, %v895_v9 }
 0x3cf   :  { %v886_v28 = vsel %vm885_vm11, %v1546_v16, %v882_v20  ;;  %v897_v29 = vadd.f32 %v1548_v23, %v896_v21  ;;  %v940_v16 = vld [vmem:[#allocation2 + $0x1d] ss:$8 sm:$0x7] }
 0x3d0   :  { %v891_v30 = vsel %vm888_vm12, %v890_v27, %v886_v28 }
 0x3d1   :  { %v901_v61 = vsel %vm900_vm14, %v1548_v23, %v897_v29  ;;  %v911_v6 = vmul.f32 %v891_v30, %v857_v11  ;;  %v925_v39 = vrot.slane %v891_v30, 1 }
 0x3d2   :  { %v906_v1 = vsel %vm903_vm15, %v905_v31, %v901_v61 }
 0x3d3   :  { %v912_v12 = vmul.f32 %v909_v32, %v906_v1  ;;  %v919_v44 = vadd.f32 %v915_v52, %v911_v6  ;;  %v926_v4 = vrot.slane %v906_v1, 1  ;;  %v929_v7 = vsub.f32 1.0, %v925_v39 }
 0x3d4   :  { %v933_v25 = vmul.f32 %v925_v39, %v1935_v34 }
 0x3d5   :  { %v920_v47 = vadd.f32 %v916_v43, %v912_v12  ;;  %1549 = vtanh.f32 %v919_v44  ;;  %v930_v14 = vsub.f32 1.0, %v926_v4  ;;  %v934_v45 = vmul.f32 %v926_v4, %v1937_v3 }
 0x3d7   :  { %1551 = vtanh.f32 %v920_v47 }
 0x3db   :  { %v1550_v13 = vpop.eup %1549 }
 0x3dc   :  { %v931_v26 = vmul.f32 %v1550_v13, %v929_v7 }
 0x3dd   :  { %v1552_v36 = vpop.eup %1551 }
 0x3de   :  { %v932_v37 = vmul.f32 %v1552_v36, %v930_v14  ;;  %v1975_v46 = vadd.f32 %v933_v25, %v931_v26  ;;  %v1046_v25 = vrot.slane %v940_v16, 2 }
 0x3e0   :  { %v1977_v54 = vadd.f32 %v934_v45, %v932_v37  ;;  %v941_v55 = vpack.c.bf16 %v1975_v46, %v1975_v46 }
 0x3e2   :  { %v942_v0 = vpack.c.bf16 %v1977_v54, %v1977_v54  ;;  %v945_v10 = vunpack.c.l.b16 %v941_v55 }
 0x3e4   :  { %v946_v63 = vunpack.c.l.b16 %v942_v0 }
 0x3e6   :  { %v947_v18 = vrot.slane %v946_v63, 7 }
 0x3e8   :  { %v948_v34 = vsel %vm340_vm3, %v947_v18, %v945_v10 }
 0x3e9   :  { %v949_v38 = vpack.c.b16 %v948_v34, %v948_v34 }
 0x3eb   :  { %959 = vmatmul.bf16.vlgmr.msra.gmra.mxu2 %v949_v38  ;;  %972 = vmatmul.bf16.vlgmr.msra.gmra.mxu3 %v949_v38 }
 0x3ec   :  { %985 = vmatmul.bf16.vlgmr.msrb.gmra.mxu0 %v949_v38  ;;  %1237 = vmatpush.bf16.msra.mxu2 %v1675_v33 }
 0x3f0   :  { %1238 = vmatpush.bf16.msra.mxu2 %v1686_v42 }
 0x3f4   :  { %1239 = vmatpush.bf16.msra.mxu2 %v1696_v51  ;;  %v938_v51 = vld [vmem:[#allocation2 + $0x5] ss:$8 sm:$0x7] }
 0x3f5   :  { %v1045_v47 = vrot.slane %v938_v51, 2 }
 0x3f8   :  { %1240 = vmatpush.bf16.msra.mxu2 %v1706_v60 }
 0x3fc   :  { %1241 = vmatpush.bf16.msra.mxu2 %v1718_v5 }
 0x400   :  { %1242 = vmatpush.bf16.msra.mxu2 %v1729_v15 }
 0x404   :  { %1243 = vmatpush.bf16.msra.mxu2 %v1737_v19 }
 0x408   :  { %1244 = vmatpush.bf16.msra.mxu2 %v1743_v22 }
 0x469   :  { %v986_v3 = vpop.f32.mrf.mxu0 }
 0x46a   :  { %v987_v30 = vadd.f32 %v986_v3, %v1810_v35 }
 0x46c   :  { %v1039_v39 = vrot.slane %v987_v30, 1 }
 0x46e   :  { %v960_v48 = vpop.f32.mrf.mxu2  ;;  %v973_v40 = vpop.f32.mrf.mxu3 }
 0x46f   :  { %v974_v2 = vadd.f32 %v973_v40, %v1804_v56  ;;  %v961_v33 = vadd.f32 %v960_v48, %v1802_v53 }
 0x471   :  { %v992_v42 = vrot.slane %v974_v2, 7  ;;  %v988_v41 = vpop.f32.mrf.mxu0 }
 0x473   :  { %v993_v60 = vsel %vm338_vm2, %v961_v33, %v992_v42  ;;  %v994_v5 = vsel %vm340_vm3, %v961_v33, %v992_v42 }
 0x474   :  { %v995_v49 = vrot.slane %v994_v5, 1  ;;  %v998_v15 = vadd.f32 %v993_v60, %v938_v51 }
 0x476   :  { %v999_v19 = vadd.f32 %v995_v49, %v940_v16  ;;  %v1458_v50 = vmul.f32 -1.442695, %v998_v15  ;;  %v962_v22 = vpop.f32.mrf.mxu2  ;;  %v975_v23 = vpop.f32.mrf.mxu3 }
 0x477   :  { %v1068_v22 = vld [vmem:[#allocation2 + $0x6] ss:$8 sm:$0x7] }
 0x478   :  { %1553 = vpow2.f32 %v1458_v50  ;;  %v1459_v58 = vmul.f32 -1.442695, %v999_v19 }
 0x47a   :  { %1555 = vpow2.f32 %v1459_v58 }
 0x47e   :  { %v1554_v59 = vpop.eup %1553 }
 0x47f   :  { %v1006_v62 = vadd.f32 1.0, %v1554_v59 }
 0x480   :  { %v1556_v8 = vpop.eup %1555 }
 0x481   :  { %v1007_v57 = vadd.f32 1.0, %v1556_v8  ;;  %1557 = vrcp.f32 %v1006_v62  ;;  %v1019_v24 = vand.u32 2147483648, %v1006_v62  ;;  %v1017_v28 = vand.u32 2147483647, %v1006_v62 }
 0x482   :  { %vm1013_vm1 = vweird.f32 %v1006_v62  ;;  %v1070_v8 = vld [vmem:[#allocation2 + $0x1e] ss:$8 sm:$0x7] }
 0x483   :  { %1559 = vrcp.f32 %v1007_v57  ;;  %v1034_v31 = vand.u32 2147483648, %v1007_v57  ;;  %v1032_v61 = vand.u32 2147483647, %v1007_v57  ;;  %v1020_v6 = vor.u32 1.1754944e-38, %v1019_v24 }
 0x484   :  { %vm1018_vm6 = vcmp.eq.f32.partialorder %v1017_v28, 8.507059e+37  ;;  %vm1028_vm7 = vweird.f32 %v1007_v57 }
 0x485   :  { %v1035_v44 = vor.u32 1.1754944e-38, %v1034_v31  ;;  %vm1033_vm9 = vcmp.eq.f32.partialorder %v1032_v61, 8.507059e+37 }
 0x487   :  { %v1558_v9 = vpop.eup %1557 }
 0x488   :  { %v1009_v11 = vmul.f32 %v1558_v9, %v1006_v62  ;;  %vm1014_vm0 = vweird.f32 %v1558_v9 }
 0x489   :  { %v1560_v17 = vpop.eup %1559  ;;  %vm1015_vm5 = vmor %vm1013_vm1, %vm1014_vm0 }
 0x48a   :  { %v1010_v20 = vsub.f32 1.0, %v1009_v11  ;;  %v1024_v21 = vmul.f32 %v1560_v17, %v1007_v57  ;;  %vm1029_vm4 = vweird.f32 %v1560_v17 }
 0x48b   :  { %vm1030_vm8 = vmor %vm1028_vm7, %vm1029_vm4 }
 0x48c   :  { %v1011_v27 = vmul.f32 %v1558_v9, %v1010_v20  ;;  %v1025_v29 = vsub.f32 1.0, %v1024_v21 }
 0x48e   :  { %v1012_v52 = vadd.f32 %v1558_v9, %v1011_v27  ;;  %v1026_v32 = vmul.f32 %v1560_v17, %v1025_v29 }
 0x490   :  { %v1016_v1 = vsel %vm1015_vm5, %v1558_v9, %v1012_v52  ;;  %v1027_v12 = vadd.f32 %v1560_v17, %v1026_v32 }
 0x491   :  { %v1021_v43 = vsel %vm1018_vm6, %v1020_v6, %v1016_v1 }
 0x492   :  { %v1031_v4 = vsel %vm1030_vm8, %v1560_v17, %v1027_v12  ;;  %v1041_v7 = vmul.f32 %v1021_v43, %v987_v30  ;;  %v1055_v37 = vrot.slane %v1021_v43, 1 }
 0x493   :  { %v1036_v13 = vsel %vm1033_vm9, %v1035_v44, %v1031_v4 }
 0x494   :  { %v1042_v14 = vmul.f32 %v1039_v39, %v1036_v13  ;;  %v1049_v26 = vadd.f32 %v1045_v47, %v1041_v7  ;;  %v1056_v45 = vrot.slane %v1036_v13, 1  ;;  %v1059_v55 = vsub.f32 1.0, %v1055_v37 }
 0x495   :  { %v1063_v10 = vmul.f32 %v1055_v37, %v1975_v46 }
 0x496   :  { %v1050_v36 = vadd.f32 %v1046_v25, %v1042_v14  ;;  %1561 = vtanh.f32 %v1049_v26  ;;  %v1060_v63 = vsub.f32 1.0, %v1056_v45  ;;  %v1064_v3 = vmul.f32 %v1056_v45, %v1977_v54 }
 0x498   :  { %1563 = vtanh.f32 %v1050_v36  ;;  %v1175_v36 = vrot.slane %v1068_v22, 2 }
 0x49c   :  { %v1562_v0 = vpop.eup %1561 }
 0x49d   :  { %v1061_v18 = vmul.f32 %v1562_v0, %v1059_v55 }
 0x49e   :  { %v1564_v34 = vpop.eup %1563 }
 0x49f   :  { %v1062_v38 = vmul.f32 %v1564_v34, %v1060_v63  ;;  %v1999_v48 = vadd.f32 %v1063_v10, %v1061_v18  ;;  %v1176_v10 = vrot.slane %v1070_v8, 2 }
 0x4a1   :  { %v2001_v40 = vadd.f32 %v1064_v3, %v1062_v38  ;;  %v1071_v2 = vpack.c.bf16 %v1999_v48, %v1999_v48 }
 0x4a3   :  { %v1072_v33 = vpack.c.bf16 %v2001_v40, %v2001_v40  ;;  %v1075_v41 = vunpack.c.l.b16 %v1071_v2 }
 0x4a5   :  { %v1076_v42 = vunpack.c.l.b16 %v1072_v33 }
 0x4a7   :  { %v1077_v51 = vrot.slane %v1076_v42, 7 }
 0x4a9   :  { %v1078_v46 = vsel %vm340_vm3, %v1077_v51, %v1075_v41 }
 0x4aa   :  { %v1079_v60 = vpack.c.b16 %v1078_v46, %v1078_v46 }
 0x4ac   :  { %1089 = vmatmul.bf16.vlgmr.msrb.gmra.mxu1 %v1079_v60  ;;  %1102 = vmatmul.bf16.vlgmr.msrb.gmra.mxu2 %v1079_v60 }
 0x4ad   :  { %1115 = vmatmul.bf16.vlgmr.msrb.gmra.mxu3 %v1079_v60 }
 0x529   :  { %v1090_v54 = vpop.f32.mrf.mxu1 }
 0x52a   :  { %v1091_v19 = vadd.f32 %v1090_v54, %v1802_v53 }
 0x52f   :  { %v1103_v5 = vpop.f32.mrf.mxu2 }
 0x530   :  { %v1104_v49 = vadd.f32 %v1103_v5, %v1804_v56  ;;  %v1116_v15 = vpop.f32.mrf.mxu3 }
 0x531   :  { %v1092_v16 = vpop.f32.mrf.mxu1  ;;  %v1117_v43 = vadd.f32 %v1116_v15, %v1810_v35 }
 0x532   :  { %v1122_v50 = vrot.slane %v1104_v49, 7 }
 0x533   :  { %v1169_v45 = vrot.slane %v1117_v43, 1 }
 0x534   :  { %v1123_v23 = vsel %vm338_vm2, %v1091_v19, %v1122_v50  ;;  %v1124_v58 = vsel %vm340_vm3, %v1091_v19, %v1122_v50 }
 0x535   :  { %v1125_v59 = vrot.slane %v1124_v58, 1  ;;  %v1128_v62 = vadd.f32 %v1123_v23, %v1068_v22 }
 0x537   :  { %v1129_v57 = vadd.f32 %v1125_v59, %v1070_v8  ;;  %v1460_v9 = vmul.f32 -1.442695, %v1128_v62  ;;  %v1105_v11 = vpop.f32.mrf.mxu2 }
 0x538   :  { %v1118_v17 = vpop.f32.mrf.mxu3 }
 0x539   :  { %1565 = vpow2.f32 %v1460_v9  ;;  %v1461_v20 = vmul.f32 -1.442695, %v1129_v57  ;;  %v1198_v57 = vld [vmem:[#allocation2 + $0x7] ss:$8 sm:$0x7] }
 0x53b   :  { %1567 = vpow2.f32 %v1461_v20 }
 0x53f   :  { %v1566_v21 = vpop.eup %1565 }
 0x540   :  { %v1136_v24 = vadd.f32 1.0, %v1566_v21  ;;  %v1200_v21 = vld [vmem:[#allocation2 + $0x1f] ss:$8 sm:$0x7] }
 0x541   :  { %v1568_v27 = vpop.eup %1567 }
 0x542   :  { %v1137_v28 = vadd.f32 1.0, %v1568_v27  ;;  %1569 = vrcp.f32 %v1136_v24  ;;  %v1149_v61 = vand.u32 2147483648, %v1136_v24  ;;  %v1147_v1 = vand.u32 2147483647, %v1136_v24 }
 0x543   :  { %vm1143_vm11 = vweird.f32 %v1136_v24 }
 0x544   :  { %1571 = vrcp.f32 %v1137_v28  ;;  %v1164_v44 = vand.u32 2147483648, %v1137_v28  ;;  %v1162_v4 = vand.u32 2147483647, %v1137_v28  ;;  %v1150_v7 = vor.u32 1.1754944e-38, %v1149_v61 }
 0x545   :  { %vm1148_vm14 = vcmp.eq.f32.partialorder %v1147_v1, 8.507059e+37  ;;  %vm1158_vm15 = vweird.f32 %v1137_v28 }
 0x546   :  { %v1165_v26 = vor.u32 1.1754944e-38, %v1164_v44  ;;  %vm1163_vm1 = vcmp.eq.f32.partialorder %v1162_v4, 8.507059e+37 }
 0x548   :  { %v1570_v29 = vpop.eup %1569 }
 0x549   :  { %v1139_v30 = vmul.f32 %v1570_v29, %v1136_v24  ;;  %vm1144_vm10 = vweird.f32 %v1570_v29 }
 0x54a   :  { %v1572_v31 = vpop.eup %1571  ;;  %vm1145_vm13 = vmor %vm1143_vm11, %vm1144_vm10 }
 0x54b   :  { %v1140_v52 = vsub.f32 1.0, %v1139_v30  ;;  %v1154_v32 = vmul.f32 %v1572_v31, %v1137_v28  ;;  %vm1159_vm12 = vweird.f32 %v1572_v31 }
 0x54c   :  { %vm1160_vm0 = vmor %vm1158_vm15, %vm1159_vm12 }
 0x54d   :  { %v1141_v6 = vmul.f32 %v1570_v29, %v1140_v52  ;;  %v1155_v12 = vsub.f32 1.0, %v1154_v32 }
 0x54f   :  { %v1142_v47 = vadd.f32 %v1570_v29, %v1141_v6  ;;  %v1156_v39 = vmul.f32 %v1572_v31, %v1155_v12 }
 0x551   :  { %v1146_v13 = vsel %vm1145_vm13, %v1570_v29, %v1142_v47  ;;  %v1157_v14 = vadd.f32 %v1572_v31, %v1156_v39 }
 0x552   :  { %v1151_v25 = vsel %vm1148_vm14, %v1150_v7, %v1146_v13 }
 0x553   :  { %v1161_v37 = vsel %vm1160_vm0, %v1572_v31, %v1157_v14  ;;  %v1171_v55 = vmul.f32 %v1151_v25, %v1117_v43  ;;  %v1185_v38 = vrot.slane %v1151_v25, 1 }
 0x554   :  { %v1166_v0 = vsel %vm1163_vm1, %v1165_v26, %v1161_v37 }
 0x555   :  { %v1172_v63 = vmul.f32 %v1169_v45, %v1166_v0  ;;  %v1179_v18 = vadd.f32 %v1175_v36, %v1171_v55  ;;  %v1186_v3 = vrot.slane %v1166_v0, 1  ;;  %v1189_v2 = vsub.f32 1.0, %v1185_v38 }
 0x556   :  { %v1193_v51 = vmul.f32 %v1185_v38, %v1999_v48 }
 0x557   :  { %v1180_v34 = vadd.f32 %v1176_v10, %v1172_v63  ;;  %1573 = vtanh.f32 %v1179_v18  ;;  %v1190_v42 = vsub.f32 1.0, %v1186_v3  ;;  %v1194_v54 = vmul.f32 %v1186_v3, %v2001_v40 }
 0x558   :  { %v1305_v10 = vrot.slane %v1198_v57, 2 }
 0x559   :  { %1575 = vtanh.f32 %v1180_v34 }
 0x55d   :  { %v1574_v33 = vpop.eup %1573 }
 0x55e   :  { %v1191_v41 = vmul.f32 %v1574_v33, %v1189_v2  ;;  %v1306_v2 = vrot.slane %v1200_v21, 2 }
 0x55f   :  { %v1576_v46 = vpop.eup %1575 }
 0x560   :  { %v1192_v60 = vmul.f32 %v1576_v46, %v1190_v42  ;;  %v2015_v5 = vadd.f32 %v1193_v51, %v1191_v41 }
 0x562   :  { %v2017_v49 = vadd.f32 %v1194_v54, %v1192_v60  ;;  %v1201_v15 = vpack.c.bf16 %v2015_v5, %v2015_v5 }
 0x564   :  { %v1202_v16 = vpack.c.bf16 %v2017_v49, %v2017_v49  ;;  %v1205_v50 = vunpack.c.l.b16 %v1201_v15 }
 0x566   :  { %v1206_v19 = vunpack.c.l.b16 %v1202_v16 }
 0x568   :  { %v1207_v22 = vrot.slane %v1206_v19, 7 }
 0x56a   :  { %v1208_v23 = vsel %vm340_vm3, %v1207_v22, %v1205_v50 }
 0x56b   :  { %v1209_v48 = vpack.c.b16 %v1208_v23, %v1208_v23 }
 0x56d   :  { %1219 = vmatmul.bf16.vlgmr.msra.gmra.mxu0 %v1209_v48  ;;  %1232 = vmatmul.bf16.vlgmr.msra.gmra.mxu1 %v1209_v48 }
 0x56e   :  { %1245 = vmatmul.bf16.vlgmr.msra.gmra.mxu2 %v1209_v48 }
 0x5ea   :  { %v1220_v40 = vpop.f32.mrf.mxu0  ;;  %v1233_v58 = vpop.f32.mrf.mxu1 }
 0x5eb   :  { %v1234_v59 = vadd.f32 %v1233_v58, %v1804_v56  ;;  %v1221_v62 = vadd.f32 %v1220_v40, %v1802_v53 }
 0x5ed   :  { %v1252_v8 = vrot.slane %v1234_v59, 7 }
 0x5ef   :  { %v1253_v9 = vsel %vm338_vm2, %v1221_v62, %v1252_v8  ;;  %v1254_v11 = vsel %vm340_vm3, %v1221_v62, %v1252_v8 }
 0x5f0   :  { %v1255_v17 = vrot.slane %v1254_v11, 1  ;;  %v1258_v20 = vadd.f32 %v1253_v9, %v1198_v57 }
 0x5f1   :  { %v1246_v24 = vpop.f32.mrf.mxu2 }
 0x5f2   :  { %v1259_v27 = vadd.f32 %v1255_v17, %v1200_v21  ;;  %v1462_v28 = vmul.f32 -1.442695, %v1258_v20  ;;  %v1222_v29 = vpop.f32.mrf.mxu0  ;;  %v1235_v30 = vpop.f32.mrf.mxu1  ;;  %v1247_v13 = vadd.f32 %v1246_v24, %v1810_v35 }
 0x5f4   :  { %1577 = vpow2.f32 %v1462_v28  ;;  %v1463_v31 = vmul.f32 -1.442695, %v1259_v27  ;;  %v1299_v34 = vrot.slane %v1247_v13, 1 }
 0x5f6   :  { %1579 = vpow2.f32 %v1463_v31 }
 0x5f9   :  { %v1248_v56 = vpop.f32.mrf.mxu2 }
 0x5fa   :  { %v1578_v52 = vpop.eup %1577 }
 0x5fb   :  { %v1266_v53 = vadd.f32 1.0, %v1578_v52 }
 0x5fc   :  { %v1580_v32 = vpop.eup %1579 }
 0x5fd   :  { %v1267_v61 = vadd.f32 1.0, %v1580_v32  ;;  %1581 = vrcp.f32 %v1266_v53  ;;  %v1279_v47 = vand.u32 2147483648, %v1266_v53  ;;  %v1277_v4 = vand.u32 2147483647, %v1266_v53 }
 0x5fe   :  { %vm1273_vm3 = vweird.f32 %v1266_v53 }
 0x5ff   :  { %1583 = vrcp.f32 %v1267_v61  ;;  %v1294_v14 = vand.u32 2147483648, %v1267_v61  ;;  %v1292_v36 = vand.u32 2147483647, %v1267_v61  ;;  %v1280_v37 = vor.u32 1.1754944e-38, %v1279_v47 }
 0x600   :  { %vm1278_vm6 = vcmp.eq.f32.partialorder %v1277_v4, 8.507059e+37  ;;  %vm1288_vm7 = vweird.f32 %v1267_v61 }
 0x601   :  { %v1295_v63 = vor.u32 1.1754944e-38, %v1294_v14  ;;  %vm1293_vm9 = vcmp.eq.f32.partialorder %v1292_v36, 8.507059e+37 }
 0x603   :  { %v1582_v6 = vpop.eup %1581 }
 0x604   :  { %v1269_v1 = vmul.f32 %v1582_v6, %v1266_v53  ;;  %vm1274_vm2 = vweird.f32 %v1582_v6 }
 0x605   :  { %v1584_v12 = vpop.eup %1583  ;;  %vm1275_vm5 = vmor %vm1273_vm3, %vm1274_vm2 }
 0x606   :  { %v1270_v43 = vsub.f32 1.0, %v1269_v1  ;;  %v1284_v44 = vmul.f32 %v1584_v12, %v1267_v61  ;;  %vm1289_vm4 = vweird.f32 %v1584_v12 }
 0x607   :  { %vm1290_vm8 = vmor %vm1288_vm7, %vm1289_vm4 }
 0x608   :  { %v1271_v39 = vmul.f32 %v1582_v6, %v1270_v43  ;;  %v1285_v7 = vsub.f32 1.0, %v1284_v44 }
 0x60a   :  { %v1272_v25 = vadd.f32 %v1582_v6, %v1271_v39  ;;  %v1286_v26 = vmul.f32 %v1584_v12, %v1285_v7 }
 0x60c   :  { %v1276_v45 = vsel %vm1275_vm5, %v1582_v6, %v1272_v25  ;;  %v1287_v55 = vadd.f32 %v1584_v12, %v1286_v26 }
 0x60d   :  { %v1281_v0 = vsel %vm1278_vm6, %v1280_v37, %v1276_v45 }
 0x60e   :  { %v1291_v18 = vsel %vm1290_vm8, %v1584_v12, %v1287_v55  ;;  %v1301_v35 = vmul.f32 %v1281_v0, %v1247_v13  ;;  %v1315_v41 = vrot.slane %v1281_v0, 1 }
 0x60f   :  { %v1296_v38 = vsel %vm1293_vm9, %v1295_v63, %v1291_v18 }
 0x610   :  { %v1302_v3 = vmul.f32 %v1299_v34, %v1296_v38  ;;  %v1309_v33 = vadd.f32 %v1305_v10, %v1301_v35  ;;  %v1316_v51 = vrot.slane %v1296_v38, 1  ;;  %v1319_v46 = vsub.f32 1.0, %v1315_v41 }
 0x611   :  { %v1323_v16 = vmul.f32 %v1315_v41, %v2015_v5 }
 0x612   :  { %v1310_v42 = vadd.f32 %v1306_v2, %v1302_v3  ;;  %1585 = vtanh.f32 %v1309_v33  ;;  %v1320_v54 = vsub.f32 1.0, %v1316_v51  ;;  %v1324_v22 = vmul.f32 %v1316_v51, %v2017_v49 }
 0x614   :  { %1587 = vtanh.f32 %v1310_v42 }
 0x618   :  { %v1586_v60 = vpop.eup %1585 }
 0x619   :  { %v1321_v15 = vmul.f32 %v1586_v60, %v1319_v46 }
 0x61a   :  { %v1588_v19 = vpop.eup %1587 }
 0x61b   :  { %v1322_v50 = vmul.f32 %v1588_v19, %v1320_v54  ;;  %v1325_v23 = vadd.f32 %v1323_v16, %v1321_v15 }
 0x61d   :  { %v1326_v48 = vadd.f32 %v1324_v22, %v1322_v50  ;;  %1329 = vst [vmem:[#allocation1] ss:$9 sm:$0xff] %v1325_v23 }
 0x61f   :  { %1331 = vst [vmem:[#allocation1 + $0x1] ss:$9 sm:$0xff] %v1326_v48 }
 0x626   :  { %v1332_v40 = vld [vmem:[#allocation1] sm:$0xff] }
 0x627   :  { %1334 = vst [vmem:[#allocation3] sm:$0x3] %v1332_v40 }
 0x62e   :  { %v1338_v58 = vld [vmem:[#allocation3] sm:$0x3] }
 0x62f   :  { %1339 = vst [vmem:[%s2038_s4] sm:$0x3] %v1338_v58 }
 0x630   :  { %1344 = vsyncpa [#allocation5], 1 }

</bundles_post_ra>
